<compile_context>
chip_gen: v5e
topology: v5e:2x2
jax: 0.10.0
libtpu: 0.0.40
codegen_flags: <defaults>
</compile_context>

<pallas_src>
import functools
import math

import jax
import jax.numpy as jnp
from jax import lax
from jax.experimental import pallas as pl
from jax.experimental.pallas import tpu as pltpu

# ----------------------------- config ---------------------------------------
VOCAB = 100
HIDDEN = 32
N_LAYERS = 2
N_HEADS = 4
HEAD_DIM = HIDDEN // N_HEADS
INTER = 64
MAX_POS = 16
N_LABELS = 3
LOGIT_PAD = 128          # lane-dense classifier output; real logits = [:, :N_LABELS]
CLS_ROWS = 8             # sublane-granularity block holding the [CLS] row (row 0)
LN_EPS = 1e-12
BF16 = jnp.bfloat16

# Row layout of the packed small-vector array (all HIDDEN-sized vectors).
_ROW_EMB_G, _ROW_EMB_B, _ROW_POOL_B = 0, 1, 2
_LAYER_VEC_BASE = 3
_ROWS_PER_LAYER = 6      # bo, ln1_g, ln1_b, bf, ln2_g, ln2_b


# ----------------------------- in-kernel helpers ------------------------------
def _layer_norm(h, gamma, beta):
    mu = jnp.mean(h, axis=-1, keepdims=True)
    d = h - mu
    var = jnp.mean(d * d, axis=-1, keepdims=True)
    return d * lax.rsqrt(var + LN_EPS) * gamma + beta


def _gelu(y):
    # TODO(synk): HF BERT uses exact erf-GELU; tanh approximation used here.
    c = math.sqrt(2.0 / math.pi)
    return 0.5 * y * (1.0 + jnp.tanh(c * (y + 0.044715 * y * y * y)))


# ----------------------------- fused kernel -----------------------------------
def _bert_kernel(emb_ref, mask_ref, vecs_ref, bi_ref, wqkv_ref, bqkv_ref,
                 wo_ref, wi_ref, wf_ref, pool_w_ref, cls_w_ref, cls_b_ref,
                 out_ref, *, seq):
    """One grid step == one sequence (batch element)."""
    vecs = vecs_ref[...]                                     # (16, H) f32 row-vectors

    # Embedding LayerNorm.
    x = _layer_norm(emb_ref[...],
                    vecs[_ROW_EMB_G:_ROW_EMB_G + 1],
                    vecs[_ROW_EMB_B:_ROW_EMB_B + 1])         # (S, H) f32

    # Additive key mask, broadcast ONCE for all heads/layers (hoisted).
    key_bias = jnp.broadcast_to(mask_ref[...], (N_HEADS, seq, seq))  # (N, S, S) f32

    for l in range(N_LAYERS):
        base = _LAYER_VEC_BASE + l * _ROWS_PER_LAYER
        bo = vecs[base + 0:base + 1]
        ln1g = vecs[base + 1:base + 2]
        ln1b = vecs[base + 2:base + 3]
        bf_vec = vecs[base + 3:base + 4]
        ln2g = vecs[base + 4:base + 5]
        ln2b = vecs[base + 5:base + 6]

        x16 = x.astype(BF16)

        # Head-major fused QKV: one batched matmul over the (3*N_HEADS) virtual
        # batch axis -> (3N, S, D).  q is pre-scaled (1/sqrt(D) folded into
        # wq/bq at pack time).  No lane-offset head carving needed.
        xh = jnp.broadcast_to(x16[None], (3 * N_HEADS, seq, HIDDEN))
        qkv = lax.dot_general(xh, wqkv_ref[l],
                              (((2,), (1,)), ((0,), (0,))),
                              preferred_element_type=jnp.float32) + bqkv_ref[l]
        q = qkv[:N_HEADS]                                    # (N, S, D) leading-axis slices
        k = qkv[N_HEADS:2 * N_HEADS]
        v = qkv[2 * N_HEADS:]

        # Attention, batched over heads ('nsd,ntd->nst' / 'nst,ntd->nsd').
        s = lax.dot_general(q.astype(BF16), k.astype(BF16),
                            (((2,), (2,)), ((0,), (0,))),
                            preferred_element_type=jnp.float32)      # (N, S, S)
        s = s + key_bias
        s = s - jnp.max(s, axis=-1, keepdims=True)
        p = jnp.exp(s)
        p = p * pl.reciprocal(jnp.sum(p, axis=-1, keepdims=True), approx=True)

        ctx = lax.dot_general(p.astype(BF16), v.astype(BF16),
                              (((2,), (1,)), ((0,), (0,))),
                              preferred_element_type=jnp.float32)    # (N, S, D)

        # Output projection accumulated over per-head wo slices (no ctx scratch,
        # no narrow masked stores).
        attn = lax.dot_general(ctx.astype(BF16), wo_ref[l],
                               (((2,), (1,)), ((0,), (0,))),
                               preferred_element_type=jnp.float32)   # (N, S, H)
        attn = jnp.sum(attn, axis=0) + bo                            # (S, H)
        x = _layer_norm(attn + x, ln1g, ln1b)

        # Feed-forward (GELU) + residual + LayerNorm.
        x16 = x.astype(BF16)
        h1 = jnp.dot(x16, wi_ref[l], preferred_element_type=jnp.float32) + bi_ref[l]
        h1 = _gelu(h1)
        ffn = jnp.dot(h1.astype(BF16), wf_ref[l],
                      preferred_element_type=jnp.float32) + bf_vec
        x = _layer_norm(ffn + x, ln2g, ln2b)

    # Pooler + classifier on the leading sublane block only (row 0 = [CLS]);
    # padded query rows are never read by the wrapper.
    cls_blk = x[:CLS_ROWS]
    pooled = jnp.tanh(jnp.dot(cls_blk.astype(BF16), pool_w_ref[...],
                              preferred_element_type=jnp.float32)
                      + vecs[_ROW_POOL_B:_ROW_POOL_B + 1])
    out_ref[...] = (jnp.dot(pooled.astype(BF16), cls_w_ref[...],
                            preferred_element_type=jnp.float32)
                    + cls_b_ref[...])


# ----------------------------- params ----------------------------------------
def init_params(key):
    keys = iter(jax.random.split(key, 128))

    def nrm(shape):
        return (0.02 * jax.random.normal(next(keys), shape)).astype(jnp.float32)

    params = {
        "word_emb": nrm((VOCAB, HIDDEN)),
        "pos_emb": nrm((MAX_POS, HIDDEN)),
        "type_emb": nrm((2, HIDDEN)),
        "emb_ln_g": jnp.ones((HIDDEN,), jnp.float32),
        "emb_ln_b": jnp.zeros((HIDDEN,), jnp.float32),
        "pool_w": nrm((HIDDEN, HIDDEN)),
        "pool_b": jnp.zeros((HIDDEN,), jnp.float32),
        "cls_w": nrm((HIDDEN, N_LABELS)),
        "cls_b": jnp.zeros((N_LABELS,), jnp.float32),
        "layers": [],
    }
    for _ in range(N_LAYERS):
        params["layers"].append({
            "wq": nrm((HIDDEN, HIDDEN)), "bq": jnp.zeros((HIDDEN,), jnp.float32),
            "wk": nrm((HIDDEN, HIDDEN)), "bk": jnp.zeros((HIDDEN,), jnp.float32),
            "wv": nrm((HIDDEN, HIDDEN)), "bv": jnp.zeros((HIDDEN,), jnp.float32),
            "wo": nrm((HIDDEN, HIDDEN)), "bo": jnp.zeros((HIDDEN,), jnp.float32),
            "ln1_g": jnp.ones((HIDDEN,), jnp.float32),
            "ln1_b": jnp.zeros((HIDDEN,), jnp.float32),
            "wi": nrm((HIDDEN, INTER)), "bi": jnp.zeros((INTER,), jnp.float32),
            "wf": nrm((INTER, HIDDEN)), "bf": jnp.zeros((HIDDEN,), jnp.float32),
            "ln2_g": jnp.ones((HIDDEN,), jnp.float32),
            "ln2_b": jnp.zeros((HIDDEN,), jnp.float32),
        })
    return params


def pack_params(params):
    """ONE-TIME packing of weights into kernel-friendly (mostly bf16) arrays."""
    scale = 1.0 / math.sqrt(HEAD_DIM)

    def to_heads(w):                      # (H, H) -> (N_HEADS, H, HEAD_DIM)
        return w.reshape(HIDDEN, N_HEADS, HEAD_DIM).transpose(1, 0, 2)

    def bias_heads(b):                    # (H,) -> (N_HEADS, 1, HEAD_DIM)
        return b.reshape(N_HEADS, 1, HEAD_DIM)

    wqkv, bqkv, wo, wi, wf, bi = [], [], [], [], [], []
    vec_rows = [params["emb_ln_g"], params["emb_ln_b"], params["pool_b"]]
    for lyr in params["layers"]:
        wqkv.append(jnp.concatenate([to_heads(lyr["wq"] * scale),
                                     to_heads(lyr["wk"]),
                                     to_heads(lyr["wv"])], axis=0))     # (3N, H, D)
        bqkv.append(jnp.concatenate([bias_heads(lyr["bq"] * scale),
                                     bias_heads(lyr["bk"]),
                                     bias_heads(lyr["bv"])], axis=0))   # (3N, 1, D)
        wo.append(lyr["wo"].reshape(N_HEADS, HEAD_DIM, HIDDEN))         # (N, D, H)
        wi.append(lyr["wi"])
        wf.append(lyr["wf"])
        bi.append(lyr["bi"][None, :])
        vec_rows += [lyr["bo"], lyr["ln1_g"], lyr["ln1_b"],
                     lyr["bf"], lyr["ln2_g"], lyr["ln2_b"]]

    n_pad = (-len(vec_rows)) % 8
    vecs = jnp.stack(vec_rows + [jnp.zeros((HIDDEN,), jnp.float32)] * n_pad)

    cls_w_pad = jnp.zeros((HIDDEN, LOGIT_PAD), jnp.float32).at[:, :N_LABELS].set(
        params["cls_w"])
    cls_b_pad = jnp.zeros((1, LOGIT_PAD), jnp.float32).at[0, :N_LABELS].set(
        params["cls_b"])

    return {
        # embedding tables stay f32 for the gather glue in the wrapper
        "word_emb": params["word_emb"],
        "pos_emb": params["pos_emb"],
        "type_emb": params["type_emb"],
        # kernel inputs
        "vecs": vecs,                                   # (16, H)        f32
        "bi": jnp.stack(bi),                            # (L, 1, I)      f32
        "wqkv": jnp.stack(wqkv).astype(BF16),           # (L, 3N, H, D)  bf16
        "bqkv": jnp.stack(bqkv),                        # (L, 3N, 1, D)  f32
        "wo": jnp.stack(wo).astype(BF16),               # (L, N, D, H)   bf16
        "wi": jnp.stack(wi).astype(BF16),               # (L, H, I)      bf16
        "wf": jnp.stack(wf).astype(BF16),               # (L, I, H)      bf16
        "pool_w": params["pool_w"].astype(BF16),        # (H, H)         bf16
        "cls_w": cls_w_pad.astype(BF16),                # (H, 128)       bf16
        "cls_b": cls_b_pad,                             # (1, 128)       f32
    }


# ----------------------------- forward ----------------------------------------
def bert_classifier_forward(packed, input_ids, attention_mask):
    """Returns logits (B, N_LABELS), matching BertForSequenceClassification(...)[0]."""
    b, s = input_ids.shape

    # Embeddings: word + position + token_type(=0).  (gather = plain-JAX glue)
    # TODO(synk): token_type_ids hard-coded to 0, like the original wrapper.
    we = packed["word_emb"][input_ids]                        # (B,S,H)
    pe = packed["pos_emb"][jnp.arange(s)][None, :, :]         # (1,S,H)
    te = packed["type_emb"][0][None, None, :]                 # (1,1,H)
    emb = (we + pe + te).reshape(b * s, HIDDEN).astype(jnp.float32)

    # Extended attention mask: (1 - mask) * -10000, additive on the key axis.
    mask_add = ((1.0 - attention_mask.astype(jnp.float32)) * -10000.0
                ).reshape(b, 1, s)

    # TODO(synk): at real bert-base sizes, stream per-layer weights with a grid
    # axis over layers (block (1, ...) + "arbitrary") instead of keeping all
    # layers VMEM-resident (v7x only has 64 MiB VMEM).
    out = pl.pallas_call(
        functools.partial(_bert_kernel, seq=s),
        out_shape=jax.ShapeDtypeStruct((b * CLS_ROWS, LOGIT_PAD), jnp.float32),
        grid_spec=pltpu.PrefetchScalarGridSpec(
            num_scalar_prefetch=0,
            grid=(b,),
            in_specs=[
                pl.BlockSpec((s, HIDDEN), lambda i: (i, 0)),            # emb
                pl.BlockSpec((1, 1, s), lambda i: (i, 0, 0)),           # mask
                pl.BlockSpec(packed["vecs"].shape, lambda i: (0, 0)),   # small vecs
                pl.BlockSpec(packed["bi"].shape, lambda i: (0, 0, 0)),
                pl.BlockSpec(packed["wqkv"].shape, lambda i: (0, 0, 0, 0)),
                pl.BlockSpec(packed["bqkv"].shape, lambda i: (0, 0, 0, 0)),
                pl.BlockSpec(packed["wo"].shape, lambda i: (0, 0, 0, 0)),
                pl.BlockSpec(packed["wi"].shape, lambda i: (0, 0, 0)),
                pl.BlockSpec(packed["wf"].shape, lambda i: (0, 0, 0)),
                pl.BlockSpec(packed["pool_w"].shape, lambda i: (0, 0)),
                pl.BlockSpec(packed["cls_w"].shape, lambda i: (0, 0)),
                pl.BlockSpec(packed["cls_b"].shape, lambda i: (0, 0)),
            ],
            out_specs=pl.BlockSpec((CLS_ROWS, LOGIT_PAD), lambda i: (i, 0)),
        ),
        compiler_params=pltpu.CompilerParams(
            dimension_semantics=("parallel",)),
    )(emb, mask_add, packed["vecs"], packed["bi"], packed["wqkv"],
      packed["bqkv"], packed["wo"], packed["wi"], packed["wf"],
      packed["pool_w"], packed["cls_w"], packed["cls_b"])

    # Row 0 of each per-sequence CLS block, first N_LABELS lanes.
    return out.reshape(b, CLS_ROWS, LOGIT_PAD)[:, 0, :N_LABELS]


# ----------------------------- main ---------------------------------------------
if __name__ == "__main__":
    key = jax.random.PRNGKey(0)
    pkey, ikey = jax.random.split(key)

    params = init_params(pkey)
    packed = pack_params(params)            # one-time weight packing (not per call)

    B, S = 2, 8
    input_ids = jax.random.randint(ikey, (B, S), minval=0, maxval=VOCAB,
                                   dtype=jnp.int32)
    attention_mask = jnp.array([[1, 1, 1, 1, 1, 1, 0, 0],
                                [1, 1, 1, 1, 1, 1, 1, 1]], dtype=jnp.int32)

    fwd = jax.jit(bert_classifier_forward)
    logits = jax.block_until_ready(fwd(packed, input_ids, attention_mask))
    assert logits.shape == (B, N_LABELS) and logits.dtype == jnp.float32
    assert bool(jnp.all(jnp.isfinite(logits)))
    print("KERNEL_OK")
</pallas_src>

<mosaic_0001>
module attributes {stable_mosaic.version = 11 : i64} {
  func.func @_bert_kernel(%arg0: i32, %arg1: memref<8x32xf32, #tpu.memory_space<vmem>>, %arg2: memref<1x1x8xf32, #tpu.memory_space<vmem>>, %arg3: memref<16x32xf32, #tpu.memory_space<vmem>>, %arg4: memref<2x1x64xf32, #tpu.memory_space<vmem>>, %arg5: memref<2x12x32x8xbf16, #tpu.memory_space<vmem>>, %arg6: memref<2x12x1x8xf32, #tpu.memory_space<vmem>>, %arg7: memref<2x4x8x32xbf16, #tpu.memory_space<vmem>>, %arg8: memref<2x32x64xbf16, #tpu.memory_space<vmem>>, %arg9: memref<2x64x32xbf16, #tpu.memory_space<vmem>>, %arg10: memref<32x32xbf16, #tpu.memory_space<vmem>>, %arg11: memref<32x128xbf16, #tpu.memory_space<vmem>>, %arg12: memref<1x128xf32, #tpu.memory_space<vmem>>, %arg13: memref<8x128xf32, #tpu.memory_space<vmem>>) attributes {dimension_semantics = [#tpu.dimension_semantics<parallel>], iteration_bounds = array<i64: 2>, scalar_prefetch = 0 : i64, scratch_operands = 0 : i64, tpu.core_type = #tpu.core_type<tc>, window_params = [{transform_indices = @transform_0, window_bounds = array<i64: 8, 32>}, {transform_indices = @transform_1, window_bounds = array<i64: 1, 1, 8>}, {pipeline_mode = #tpu.pipeline_mode<synchronous>, transform_indices = @transform_2, window_bounds = array<i64: 16, 32>}, {pipeline_mode = #tpu.pipeline_mode<synchronous>, transform_indices = @transform_3, window_bounds = array<i64: 2, 1, 64>}, {pipeline_mode = #tpu.pipeline_mode<synchronous>, transform_indices = @transform_4, window_bounds = array<i64: 2, 12, 32, 8>}, {pipeline_mode = #tpu.pipeline_mode<synchronous>, transform_indices = @transform_5, window_bounds = array<i64: 2, 12, 1, 8>}, {pipeline_mode = #tpu.pipeline_mode<synchronous>, transform_indices = @transform_6, window_bounds = array<i64: 2, 4, 8, 32>}, {pipeline_mode = #tpu.pipeline_mode<synchronous>, transform_indices = @transform_7, window_bounds = array<i64: 2, 32, 64>}, {pipeline_mode = #tpu.pipeline_mode<synchronous>, transform_indices = @transform_8, window_bounds = array<i64: 2, 64, 32>}, {pipeline_mode = #tpu.pipeline_mode<synchronous>, transform_indices = @transform_9, window_bounds = array<i64: 32, 32>}, {pipeline_mode = #tpu.pipeline_mode<synchronous>, transform_indices = @transform_10, window_bounds = array<i64: 32, 128>}, {pipeline_mode = #tpu.pipeline_mode<synchronous>, transform_indices = @transform_11, window_bounds = array<i64: 1, 128>}, {transform_indices = @transform_12, window_bounds = array<i64: 8, 128>}]} {
    %c0 = arith.constant 0 : index
    %c0_0 = arith.constant 0 : index
    %0 = vector.load %arg3[%c0, %c0_0] : memref<16x32xf32, #tpu.memory_space<vmem>>, vector<16x32xf32>
    %c0_1 = arith.constant 0 : index
    %c0_2 = arith.constant 0 : index
    %1 = vector.load %arg1[%c0_1, %c0_2] : memref<8x32xf32, #tpu.memory_space<vmem>>, vector<8x32xf32>
    %2 = vector.extract_strided_slice %0 {offsets = [0, 0], sizes = [1, 32], strides = [1, 1]} : vector<16x32xf32> to vector<1x32xf32>
    %3 = vector.extract_strided_slice %0 {offsets = [1, 0], sizes = [1, 32], strides = [1, 1]} : vector<16x32xf32> to vector<1x32xf32>
    %cst = arith.constant dense<0.000000e+00> : vector<8xf32>
    %4 = vector.multi_reduction <add>, %1, %cst [1] : vector<8x32xf32> to vector<8xf32>
    %5 = vector.shape_cast %4 : vector<8xf32> to vector<8x1xf32>
    %cst_3 = arith.constant 3.200000e+01 : f32
    %6 = vector.broadcast %cst_3 : f32 to vector<8x1xf32>
    %7 = arith.divf %5, %6 : vector<8x1xf32>
    %8 = vector.broadcast %7 : vector<8x1xf32> to vector<8x32xf32>
    %9 = arith.subf %1, %8 : vector<8x32xf32>
    %10 = arith.mulf %9, %9 : vector<8x32xf32>
    %cst_4 = arith.constant dense<0.000000e+00> : vector<8xf32>
    %11 = vector.multi_reduction <add>, %10, %cst_4 [1] : vector<8x32xf32> to vector<8xf32>
    %12 = vector.shape_cast %11 : vector<8xf32> to vector<8x1xf32>
    %cst_5 = arith.constant 3.200000e+01 : f32
    %13 = vector.broadcast %cst_5 : f32 to vector<8x1xf32>
    %14 = arith.divf %12, %13 : vector<8x1xf32>
    %cst_6 = arith.constant 9.99999996E-13 : f32
    %15 = vector.broadcast %cst_6 : f32 to vector<8x1xf32>
    %16 = arith.addf %14, %15 : vector<8x1xf32>
    %17 = math.rsqrt %16 : vector<8x1xf32>
    %18 = vector.broadcast %17 : vector<8x1xf32> to vector<8x32xf32>
    %19 = arith.mulf %9, %18 : vector<8x32xf32>
    %20 = vector.broadcast %2 : vector<1x32xf32> to vector<8x32xf32>
    %21 = arith.mulf %19, %20 : vector<8x32xf32>
    %22 = vector.broadcast %3 : vector<1x32xf32> to vector<8x32xf32>
    %23 = arith.addf %21, %22 : vector<8x32xf32>
    %c0_7 = arith.constant 0 : index
    %c0_8 = arith.constant 0 : index
    %c0_9 = arith.constant 0 : index
    %24 = vector.load %arg2[%c0_7, %c0_8, %c0_9] : memref<1x1x8xf32, #tpu.memory_space<vmem>>, vector<1x1x8xf32>
    %25 = vector.shape_cast %24 : vector<1x1x8xf32> to vector<1x1x8xf32>
    %26 = vector.broadcast %25 : vector<1x1x8xf32> to vector<4x8x8xf32>
    %27 = vector.extract_strided_slice %0 {offsets = [3, 0], sizes = [1, 32], strides = [1, 1]} : vector<16x32xf32> to vector<1x32xf32>
    %28 = vector.extract_strided_slice %0 {offsets = [4, 0], sizes = [1, 32], strides = [1, 1]} : vector<16x32xf32> to vector<1x32xf32>
    %29 = vector.extract_strided_slice %0 {offsets = [5, 0], sizes = [1, 32], strides = [1, 1]} : vector<16x32xf32> to vector<1x32xf32>
    %30 = vector.extract_strided_slice %0 {offsets = [6, 0], sizes = [1, 32], strides = [1, 1]} : vector<16x32xf32> to vector<1x32xf32>
    %31 = vector.extract_strided_slice %0 {offsets = [7, 0], sizes = [1, 32], strides = [1, 1]} : vector<16x32xf32> to vector<1x32xf32>
    %32 = vector.extract_strided_slice %0 {offsets = [8, 0], sizes = [1, 32], strides = [1, 1]} : vector<16x32xf32> to vector<1x32xf32>
    %33 = arith.truncf %23 : vector<8x32xf32> to vector<8x32xbf16>
    %34 = vector.shape_cast %33 : vector<8x32xbf16> to vector<1x8x32xbf16>
    %35 = vector.shape_cast %34 : vector<1x8x32xbf16> to vector<1x8x32xbf16>
    %36 = vector.broadcast %35 : vector<1x8x32xbf16> to vector<12x8x32xbf16>
    %c0_10 = arith.constant 0 : index
    %c0_11 = arith.constant 0 : index
    %c0_12 = arith.constant 0 : index
    %c0_13 = arith.constant 0 : index
    %37 = vector.load %arg5[%c0_10, %c0_11, %c0_12, %c0_13] : memref<2x12x32x8xbf16, #tpu.memory_space<vmem>>, vector<1x12x32x8xbf16>
    %38 = vector.shape_cast %37 : vector<1x12x32x8xbf16> to vector<12x32x8xbf16>
    %cst_14 = arith.constant dense<0.000000e+00> : vector<12x8x8xf32>
    %39 = tpu.matmul %36, %38, %cst_14 {dimension_numbers = #tpu.dot_dimension_numbers<[2], [1], [1], [2], [0, 0, 0, 1, 1, 2], [0], [0]>} : vector<12x8x32xbf16>, vector<12x32x8xbf16>, vector<12x8x8xf32> -> vector<12x8x8xf32>
    %c0_15 = arith.constant 0 : index
    %c0_16 = arith.constant 0 : index
    %c0_17 = arith.constant 0 : index
    %c0_18 = arith.constant 0 : index
    %40 = vector.load %arg6[%c0_15, %c0_16, %c0_17, %c0_18] : memref<2x12x1x8xf32, #tpu.memory_space<vmem>>, vector<1x12x1x8xf32>
    %41 = vector.shape_cast %40 : vector<1x12x1x8xf32> to vector<12x1x8xf32>
    %42 = vector.broadcast %41 : vector<12x1x8xf32> to vector<12x8x8xf32>
    %43 = arith.addf %39, %42 : vector<12x8x8xf32>
    %44 = vector.extract_strided_slice %43 {offsets = [0, 0, 0], sizes = [4, 8, 8], strides = [1, 1, 1]} : vector<12x8x8xf32> to vector<4x8x8xf32>
    %45 = vector.extract_strided_slice %43 {offsets = [4, 0, 0], sizes = [4, 8, 8], strides = [1, 1, 1]} : vector<12x8x8xf32> to vector<4x8x8xf32>
    %46 = vector.extract_strided_slice %43 {offsets = [8, 0, 0], sizes = [4, 8, 8], strides = [1, 1, 1]} : vector<12x8x8xf32> to vector<4x8x8xf32>
    %47 = arith.truncf %44 : vector<4x8x8xf32> to vector<4x8x8xbf16>
    %48 = arith.truncf %45 : vector<4x8x8xf32> to vector<4x8x8xbf16>
    %cst_19 = arith.constant dense<0.000000e+00> : vector<4x8x8xf32>
    %49 = tpu.matmul %47, %48, %cst_19 {dimension_numbers = #tpu.dot_dimension_numbers<[2], [2], [1], [1], [0, 0, 0, 1, 1, 1], [0], [0]>} : vector<4x8x8xbf16>, vector<4x8x8xbf16>, vector<4x8x8xf32> -> vector<4x8x8xf32>
    %50 = arith.addf %49, %26 : vector<4x8x8xf32>
    %cst_20 = arith.constant dense<0xFF800000> : vector<4x8xf32>
    %51 = vector.multi_reduction <maximumf>, %50, %cst_20 [2] : vector<4x8x8xf32> to vector<4x8xf32>
    %52 = vector.shape_cast %51 : vector<4x8xf32> to vector<4x8x1xf32>
    %53 = vector.broadcast %52 : vector<4x8x1xf32> to vector<4x8x8xf32>
    %54 = arith.subf %50, %53 : vector<4x8x8xf32>
    %55 = math.exp %54 : vector<4x8x8xf32>
    %cst_21 = arith.constant dense<0.000000e+00> : vector<4x8xf32>
    %56 = vector.multi_reduction <add>, %55, %cst_21 [2] : vector<4x8x8xf32> to vector<4x8xf32>
    %57 = vector.shape_cast %56 : vector<4x8xf32> to vector<4x8x1xf32>
    %58 = tpu.reciprocal %57 {approx = true} : vector<4x8x1xf32> -> vector<4x8x1xf32>
    %59 = vector.broadcast %58 : vector<4x8x1xf32> to vector<4x8x8xf32>
    %60 = arith.mulf %55, %59 : vector<4x8x8xf32>
    %61 = arith.truncf %60 : vector<4x8x8xf32> to vector<4x8x8xbf16>
    %62 = arith.truncf %46 : vector<4x8x8xf32> to vector<4x8x8xbf16>
    %cst_22 = arith.constant dense<0.000000e+00> : vector<4x8x8xf32>
    %63 = tpu.matmul %61, %62, %cst_22 {dimension_numbers = #tpu.dot_dimension_numbers<[2], [1], [1], [2], [0, 0, 0, 1, 1, 2], [0], [0]>} : vector<4x8x8xbf16>, vector<4x8x8xbf16>, vector<4x8x8xf32> -> vector<4x8x8xf32>
    %64 = arith.truncf %63 : vector<4x8x8xf32> to vector<4x8x8xbf16>
    %c0_23 = arith.constant 0 : index
    %c0_24 = arith.constant 0 : index
    %c0_25 = arith.constant 0 : index
    %c0_26 = arith.constant 0 : index
    %65 = vector.load %arg7[%c0_23, %c0_24, %c0_25, %c0_26] : memref<2x4x8x32xbf16, #tpu.memory_space<vmem>>, vector<1x4x8x32xbf16>
    %66 = vector.shape_cast %65 : vector<1x4x8x32xbf16> to vector<4x8x32xbf16>
    %cst_27 = arith.constant dense<0.000000e+00> : vector<4x8x32xf32>
    %67 = tpu.matmul %64, %66, %cst_27 {dimension_numbers = #tpu.dot_dimension_numbers<[2], [1], [1], [2], [0, 0, 0, 1, 1, 2], [0], [0]>} : vector<4x8x8xbf16>, vector<4x8x32xbf16>, vector<4x8x32xf32> -> vector<4x8x32xf32>
    %cst_28 = arith.constant dense<0.000000e+00> : vector<8x32xf32>
    %68 = vector.multi_reduction <add>, %67, %cst_28 [0] : vector<4x8x32xf32> to vector<8x32xf32>
    %69 = vector.broadcast %27 : vector<1x32xf32> to vector<8x32xf32>
    %70 = arith.addf %68, %69 : vector<8x32xf32>
    %71 = arith.addf %70, %23 : vector<8x32xf32>
    %cst_29 = arith.constant dense<0.000000e+00> : vector<8xf32>
    %72 = vector.multi_reduction <add>, %71, %cst_29 [1] : vector<8x32xf32> to vector<8xf32>
    %73 = vector.shape_cast %72 : vector<8xf32> to vector<8x1xf32>
    %cst_30 = arith.constant 3.200000e+01 : f32
    %74 = vector.broadcast %cst_30 : f32 to vector<8x1xf32>
    %75 = arith.divf %73, %74 : vector<8x1xf32>
    %76 = vector.broadcast %75 : vector<8x1xf32> to vector<8x32xf32>
    %77 = arith.subf %71, %76 : vector<8x32xf32>
    %78 = arith.mulf %77, %77 : vector<8x32xf32>
    %cst_31 = arith.constant dense<0.000000e+00> : vector<8xf32>
    %79 = vector.multi_reduction <add>, %78, %cst_31 [1] : vector<8x32xf32> to vector<8xf32>
    %80 = vector.shape_cast %79 : vector<8xf32> to vector<8x1xf32>
    %cst_32 = arith.constant 3.200000e+01 : f32
    %81 = vector.broadcast %cst_32 : f32 to vector<8x1xf32>
    %82 = arith.divf %80, %81 : vector<8x1xf32>
    %cst_33 = arith.constant 9.99999996E-13 : f32
    %83 = vector.broadcast %cst_33 : f32 to vector<8x1xf32>
    %84 = arith.addf %82, %83 : vector<8x1xf32>
    %85 = math.rsqrt %84 : vector<8x1xf32>
    %86 = vector.broadcast %85 : vector<8x1xf32> to vector<8x32xf32>
    %87 = arith.mulf %77, %86 : vector<8x32xf32>
    %88 = vector.broadcast %28 : vector<1x32xf32> to vector<8x32xf32>
    %89 = arith.mulf %87, %88 : vector<8x32xf32>
    %90 = vector.broadcast %29 : vector<1x32xf32> to vector<8x32xf32>
    %91 = arith.addf %89, %90 : vector<8x32xf32>
    %92 = arith.truncf %91 : vector<8x32xf32> to vector<8x32xbf16>
    %c0_34 = arith.constant 0 : index
    %c0_35 = arith.constant 0 : index
    %c0_36 = arith.constant 0 : index
    %93 = vector.load %arg8[%c0_34, %c0_35, %c0_36] : memref<2x32x64xbf16, #tpu.memory_space<vmem>>, vector<1x32x64xbf16>
    %94 = vector.shape_cast %93 : vector<1x32x64xbf16> to vector<32x64xbf16>
    %cst_37 = arith.constant dense<0.000000e+00> : vector<8x64xf32>
    %95 = tpu.matmul %92, %94, %cst_37 {dimension_numbers = #tpu.dot_dimension_numbers<[1], [0], [0], [1], [0, 0, 1, 1], [], []>} : vector<8x32xbf16>, vector<32x64xbf16>, vector<8x64xf32> -> vector<8x64xf32>
    %c0_38 = arith.constant 0 : index
    %c0_39 = arith.constant 0 : index
    %c0_40 = arith.constant 0 : index
    %96 = vector.load %arg4[%c0_38, %c0_39, %c0_40] : memref<2x1x64xf32, #tpu.memory_space<vmem>>, vector<1x1x64xf32>
    %97 = vector.shape_cast %96 : vector<1x1x64xf32> to vector<1x64xf32>
    %98 = vector.broadcast %97 : vector<1x64xf32> to vector<8x64xf32>
    %99 = arith.addf %95, %98 : vector<8x64xf32>
    %cst_41 = arith.constant 5.000000e-01 : f32
    %100 = vector.broadcast %cst_41 : f32 to vector<8x64xf32>
    %101 = arith.mulf %100, %99 : vector<8x64xf32>
    %cst_42 = arith.constant 4.471500e-02 : f32
    %102 = vector.broadcast %cst_42 : f32 to vector<8x64xf32>
    %103 = arith.mulf %102, %99 : vector<8x64xf32>
    %104 = arith.mulf %103, %99 : vector<8x64xf32>
    %105 = arith.mulf %104, %99 : vector<8x64xf32>
    %106 = arith.addf %99, %105 : vector<8x64xf32>
    %cst_43 = arith.constant 0.797884583 : f32
    %107 = vector.broadcast %cst_43 : f32 to vector<8x64xf32>
    %108 = arith.mulf %107, %106 : vector<8x64xf32>
    %109 = math.tanh %108 : vector<8x64xf32>
    %cst_44 = arith.constant 1.000000e+00 : f32
    %110 = vector.broadcast %cst_44 : f32 to vector<8x64xf32>
    %111 = arith.addf %110, %109 : vector<8x64xf32>
    %112 = arith.mulf %101, %111 : vector<8x64xf32>
    %113 = arith.truncf %112 : vector<8x64xf32> to vector<8x64xbf16>
    %c0_45 = arith.constant 0 : index
    %c0_46 = arith.constant 0 : index
    %c0_47 = arith.constant 0 : index
    %114 = vector.load %arg9[%c0_45, %c0_46, %c0_47] : memref<2x64x32xbf16, #tpu.memory_space<vmem>>, vector<1x64x32xbf16>
    %115 = vector.shape_cast %114 : vector<1x64x32xbf16> to vector<64x32xbf16>
    %cst_48 = arith.constant dense<0.000000e+00> : vector<8x32xf32>
    %116 = tpu.matmul %113, %115, %cst_48 {dimension_numbers = #tpu.dot_dimension_numbers<[1], [0], [0], [1], [0, 0, 1, 1], [], []>} : vector<8x64xbf16>, vector<64x32xbf16>, vector<8x32xf32> -> vector<8x32xf32>
    %117 = vector.broadcast %30 : vector<1x32xf32> to vector<8x32xf32>
    %118 = arith.addf %116, %117 : vector<8x32xf32>
    %119 = arith.addf %118, %91 : vector<8x32xf32>
    %cst_49 = arith.constant dense<0.000000e+00> : vector<8xf32>
    %120 = vector.multi_reduction <add>, %119, %cst_49 [1] : vector<8x32xf32> to vector<8xf32>
    %121 = vector.shape_cast %120 : vector<8xf32> to vector<8x1xf32>
    %cst_50 = arith.constant 3.200000e+01 : f32
    %122 = vector.broadcast %cst_50 : f32 to vector<8x1xf32>
    %123 = arith.divf %121, %122 : vector<8x1xf32>
    %124 = vector.broadcast %123 : vector<8x1xf32> to vector<8x32xf32>
    %125 = arith.subf %119, %124 : vector<8x32xf32>
    %126 = arith.mulf %125, %125 : vector<8x32xf32>
    %cst_51 = arith.constant dense<0.000000e+00> : vector<8xf32>
    %127 = vector.multi_reduction <add>, %126, %cst_51 [1] : vector<8x32xf32> to vector<8xf32>
    %128 = vector.shape_cast %127 : vector<8xf32> to vector<8x1xf32>
    %cst_52 = arith.constant 3.200000e+01 : f32
    %129 = vector.broadcast %cst_52 : f32 to vector<8x1xf32>
    %130 = arith.divf %128, %129 : vector<8x1xf32>
    %cst_53 = arith.constant 9.99999996E-13 : f32
    %131 = vector.broadcast %cst_53 : f32 to vector<8x1xf32>
    %132 = arith.addf %130, %131 : vector<8x1xf32>
    %133 = math.rsqrt %132 : vector<8x1xf32>
    %134 = vector.broadcast %133 : vector<8x1xf32> to vector<8x32xf32>
    %135 = arith.mulf %125, %134 : vector<8x32xf32>
    %136 = vector.broadcast %31 : vector<1x32xf32> to vector<8x32xf32>
    %137 = arith.mulf %135, %136 : vector<8x32xf32>
    %138 = vector.broadcast %32 : vector<1x32xf32> to vector<8x32xf32>
    %139 = arith.addf %137, %138 : vector<8x32xf32>
    %140 = vector.extract_strided_slice %0 {offsets = [9, 0], sizes = [1, 32], strides = [1, 1]} : vector<16x32xf32> to vector<1x32xf32>
    %141 = vector.extract_strided_slice %0 {offsets = [10, 0], sizes = [1, 32], strides = [1, 1]} : vector<16x32xf32> to vector<1x32xf32>
    %142 = vector.extract_strided_slice %0 {offsets = [11, 0], sizes = [1, 32], strides = [1, 1]} : vector<16x32xf32> to vector<1x32xf32>
    %143 = vector.extract_strided_slice %0 {offsets = [12, 0], sizes = [1, 32], strides = [1, 1]} : vector<16x32xf32> to vector<1x32xf32>
    %144 = vector.extract_strided_slice %0 {offsets = [13, 0], sizes = [1, 32], strides = [1, 1]} : vector<16x32xf32> to vector<1x32xf32>
    %145 = vector.extract_strided_slice %0 {offsets = [14, 0], sizes = [1, 32], strides = [1, 1]} : vector<16x32xf32> to vector<1x32xf32>
    %146 = arith.truncf %139 : vector<8x32xf32> to vector<8x32xbf16>
    %147 = vector.shape_cast %146 : vector<8x32xbf16> to vector<1x8x32xbf16>
    %148 = vector.shape_cast %147 : vector<1x8x32xbf16> to vector<1x8x32xbf16>
    %149 = vector.broadcast %148 : vector<1x8x32xbf16> to vector<12x8x32xbf16>
    %c1 = arith.constant 1 : index
    %c0_54 = arith.constant 0 : index
    %c0_55 = arith.constant 0 : index
    %c0_56 = arith.constant 0 : index
    %150 = vector.load %arg5[%c1, %c0_54, %c0_55, %c0_56] : memref<2x12x32x8xbf16, #tpu.memory_space<vmem>>, vector<1x12x32x8xbf16>
    %151 = vector.shape_cast %150 : vector<1x12x32x8xbf16> to vector<12x32x8xbf16>
    %cst_57 = arith.constant dense<0.000000e+00> : vector<12x8x8xf32>
    %152 = tpu.matmul %149, %151, %cst_57 {dimension_numbers = #tpu.dot_dimension_numbers<[2], [1], [1], [2], [0, 0, 0, 1, 1, 2], [0], [0]>} : vector<12x8x32xbf16>, vector<12x32x8xbf16>, vector<12x8x8xf32> -> vector<12x8x8xf32>
    %c1_58 = arith.constant 1 : index
    %c0_59 = arith.constant 0 : index
    %c0_60 = arith.constant 0 : index
    %c0_61 = arith.constant 0 : index
    %153 = vector.load %arg6[%c1_58, %c0_59, %c0_60, %c0_61] : memref<2x12x1x8xf32, #tpu.memory_space<vmem>>, vector<1x12x1x8xf32>
    %154 = vector.shape_cast %153 : vector<1x12x1x8xf32> to vector<12x1x8xf32>
    %155 = vector.broadcast %154 : vector<12x1x8xf32> to vector<12x8x8xf32>
    %156 = arith.addf %152, %155 : vector<12x8x8xf32>
    %157 = vector.extract_strided_slice %156 {offsets = [0, 0, 0], sizes = [4, 8, 8], strides = [1, 1, 1]} : vector<12x8x8xf32> to vector<4x8x8xf32>
    %158 = vector.extract_strided_slice %156 {offsets = [4, 0, 0], sizes = [4, 8, 8], strides = [1, 1, 1]} : vector<12x8x8xf32> to vector<4x8x8xf32>
    %159 = vector.extract_strided_slice %156 {offsets = [8, 0, 0], sizes = [4, 8, 8], strides = [1, 1, 1]} : vector<12x8x8xf32> to vector<4x8x8xf32>
    %160 = arith.truncf %157 : vector<4x8x8xf32> to vector<4x8x8xbf16>
    %161 = arith.truncf %158 : vector<4x8x8xf32> to vector<4x8x8xbf16>
    %cst_62 = arith.constant dense<0.000000e+00> : vector<4x8x8xf32>
    %162 = tpu.matmul %160, %161, %cst_62 {dimension_numbers = #tpu.dot_dimension_numbers<[2], [2], [1], [1], [0, 0, 0, 1, 1, 1], [0], [0]>} : vector<4x8x8xbf16>, vector<4x8x8xbf16>, vector<4x8x8xf32> -> vector<4x8x8xf32>
    %163 = arith.addf %162, %26 : vector<4x8x8xf32>
    %cst_63 = arith.constant dense<0xFF800000> : vector<4x8xf32>
    %164 = vector.multi_reduction <maximumf>, %163, %cst_63 [2] : vector<4x8x8xf32> to vector<4x8xf32>
    %165 = vector.shape_cast %164 : vector<4x8xf32> to vector<4x8x1xf32>
    %166 = vector.broadcast %165 : vector<4x8x1xf32> to vector<4x8x8xf32>
    %167 = arith.subf %163, %166 : vector<4x8x8xf32>
    %168 = math.exp %167 : vector<4x8x8xf32>
    %cst_64 = arith.constant dense<0.000000e+00> : vector<4x8xf32>
    %169 = vector.multi_reduction <add>, %168, %cst_64 [2] : vector<4x8x8xf32> to vector<4x8xf32>
    %170 = vector.shape_cast %169 : vector<4x8xf32> to vector<4x8x1xf32>
    %171 = tpu.reciprocal %170 {approx = true} : vector<4x8x1xf32> -> vector<4x8x1xf32>
    %172 = vector.broadcast %171 : vector<4x8x1xf32> to vector<4x8x8xf32>
    %173 = arith.mulf %168, %172 : vector<4x8x8xf32>
    %174 = arith.truncf %173 : vector<4x8x8xf32> to vector<4x8x8xbf16>
    %175 = arith.truncf %159 : vector<4x8x8xf32> to vector<4x8x8xbf16>
    %cst_65 = arith.constant dense<0.000000e+00> : vector<4x8x8xf32>
    %176 = tpu.matmul %174, %175, %cst_65 {dimension_numbers = #tpu.dot_dimension_numbers<[2], [1], [1], [2], [0, 0, 0, 1, 1, 2], [0], [0]>} : vector<4x8x8xbf16>, vector<4x8x8xbf16>, vector<4x8x8xf32> -> vector<4x8x8xf32>
    %177 = arith.truncf %176 : vector<4x8x8xf32> to vector<4x8x8xbf16>
    %c1_66 = arith.constant 1 : index
    %c0_67 = arith.constant 0 : index
    %c0_68 = arith.constant 0 : index
    %c0_69 = arith.constant 0 : index
    %178 = vector.load %arg7[%c1_66, %c0_67, %c0_68, %c0_69] : memref<2x4x8x32xbf16, #tpu.memory_space<vmem>>, vector<1x4x8x32xbf16>
    %179 = vector.shape_cast %178 : vector<1x4x8x32xbf16> to vector<4x8x32xbf16>
    %cst_70 = arith.constant dense<0.000000e+00> : vector<4x8x32xf32>
    %180 = tpu.matmul %177, %179, %cst_70 {dimension_numbers = #tpu.dot_dimension_numbers<[2], [1], [1], [2], [0, 0, 0, 1, 1, 2], [0], [0]>} : vector<4x8x8xbf16>, vector<4x8x32xbf16>, vector<4x8x32xf32> -> vector<4x8x32xf32>
    %cst_71 = arith.constant dense<0.000000e+00> : vector<8x32xf32>
    %181 = vector.multi_reduction <add>, %180, %cst_71 [0] : vector<4x8x32xf32> to vector<8x32xf32>
    %182 = vector.broadcast %140 : vector<1x32xf32> to vector<8x32xf32>
    %183 = arith.addf %181, %182 : vector<8x32xf32>
    %184 = arith.addf %183, %139 : vector<8x32xf32>
    %cst_72 = arith.constant dense<0.000000e+00> : vector<8xf32>
    %185 = vector.multi_reduction <add>, %184, %cst_72 [1] : vector<8x32xf32> to vector<8xf32>
    %186 = vector.shape_cast %185 : vector<8xf32> to vector<8x1xf32>
    %cst_73 = arith.constant 3.200000e+01 : f32
    %187 = vector.broadcast %cst_73 : f32 to vector<8x1xf32>
    %188 = arith.divf %186, %187 : vector<8x1xf32>
    %189 = vector.broadcast %188 : vector<8x1xf32> to vector<8x32xf32>
    %190 = arith.subf %184, %189 : vector<8x32xf32>
    %191 = arith.mulf %190, %190 : vector<8x32xf32>
    %cst_74 = arith.constant dense<0.000000e+00> : vector<8xf32>
    %192 = vector.multi_reduction <add>, %191, %cst_74 [1] : vector<8x32xf32> to vector<8xf32>
    %193 = vector.shape_cast %192 : vector<8xf32> to vector<8x1xf32>
    %cst_75 = arith.constant 3.200000e+01 : f32
    %194 = vector.broadcast %cst_75 : f32 to vector<8x1xf32>
    %195 = arith.divf %193, %194 : vector<8x1xf32>
    %cst_76 = arith.constant 9.99999996E-13 : f32
    %196 = vector.broadcast %cst_76 : f32 to vector<8x1xf32>
    %197 = arith.addf %195, %196 : vector<8x1xf32>
    %198 = math.rsqrt %197 : vector<8x1xf32>
    %199 = vector.broadcast %198 : vector<8x1xf32> to vector<8x32xf32>
    %200 = arith.mulf %190, %199 : vector<8x32xf32>
    %201 = vector.broadcast %141 : vector<1x32xf32> to vector<8x32xf32>
    %202 = arith.mulf %200, %201 : vector<8x32xf32>
    %203 = vector.broadcast %142 : vector<1x32xf32> to vector<8x32xf32>
    %204 = arith.addf %202, %203 : vector<8x32xf32>
    %205 = arith.truncf %204 : vector<8x32xf32> to vector<8x32xbf16>
    %c1_77 = arith.constant 1 : index
    %c0_78 = arith.constant 0 : index
    %c0_79 = arith.constant 0 : index
    %206 = vector.load %arg8[%c1_77, %c0_78, %c0_79] : memref<2x32x64xbf16, #tpu.memory_space<vmem>>, vector<1x32x64xbf16>
    %207 = vector.shape_cast %206 : vector<1x32x64xbf16> to vector<32x64xbf16>
    %cst_80 = arith.constant dense<0.000000e+00> : vector<8x64xf32>
    %208 = tpu.matmul %205, %207, %cst_80 {dimension_numbers = #tpu.dot_dimension_numbers<[1], [0], [0], [1], [0, 0, 1, 1], [], []>} : vector<8x32xbf16>, vector<32x64xbf16>, vector<8x64xf32> -> vector<8x64xf32>
    %c1_81 = arith.constant 1 : index
    %c0_82 = arith.constant 0 : index
    %c0_83 = arith.constant 0 : index
    %209 = vector.load %arg4[%c1_81, %c0_82, %c0_83] : memref<2x1x64xf32, #tpu.memory_space<vmem>>, vector<1x1x64xf32>
    %210 = vector.shape_cast %209 : vector<1x1x64xf32> to vector<1x64xf32>
    %211 = vector.broadcast %210 : vector<1x64xf32> to vector<8x64xf32>
    %212 = arith.addf %208, %211 : vector<8x64xf32>
    %cst_84 = arith.constant 5.000000e-01 : f32
    %213 = vector.broadcast %cst_84 : f32 to vector<8x64xf32>
    %214 = arith.mulf %213, %212 : vector<8x64xf32>
    %cst_85 = arith.constant 4.471500e-02 : f32
    %215 = vector.broadcast %cst_85 : f32 to vector<8x64xf32>
    %216 = arith.mulf %215, %212 : vector<8x64xf32>
    %217 = arith.mulf %216, %212 : vector<8x64xf32>
    %218 = arith.mulf %217, %212 : vector<8x64xf32>
    %219 = arith.addf %212, %218 : vector<8x64xf32>
    %cst_86 = arith.constant 0.797884583 : f32
    %220 = vector.broadcast %cst_86 : f32 to vector<8x64xf32>
    %221 = arith.mulf %220, %219 : vector<8x64xf32>
    %222 = math.tanh %221 : vector<8x64xf32>
    %cst_87 = arith.constant 1.000000e+00 : f32
    %223 = vector.broadcast %cst_87 : f32 to vector<8x64xf32>
    %224 = arith.addf %223, %222 : vector<8x64xf32>
    %225 = arith.mulf %214, %224 : vector<8x64xf32>
    %226 = arith.truncf %225 : vector<8x64xf32> to vector<8x64xbf16>
    %c1_88 = arith.constant 1 : index
    %c0_89 = arith.constant 0 : index
    %c0_90 = arith.constant 0 : index
    %227 = vector.load %arg9[%c1_88, %c0_89, %c0_90] : memref<2x64x32xbf16, #tpu.memory_space<vmem>>, vector<1x64x32xbf16>
    %228 = vector.shape_cast %227 : vector<1x64x32xbf16> to vector<64x32xbf16>
    %cst_91 = arith.constant dense<0.000000e+00> : vector<8x32xf32>
    %229 = tpu.matmul %226, %228, %cst_91 {dimension_numbers = #tpu.dot_dimension_numbers<[1], [0], [0], [1], [0, 0, 1, 1], [], []>} : vector<8x64xbf16>, vector<64x32xbf16>, vector<8x32xf32> -> vector<8x32xf32>
    %230 = vector.broadcast %143 : vector<1x32xf32> to vector<8x32xf32>
    %231 = arith.addf %229, %230 : vector<8x32xf32>
    %232 = arith.addf %231, %204 : vector<8x32xf32>
    %cst_92 = arith.constant dense<0.000000e+00> : vector<8xf32>
    %233 = vector.multi_reduction <add>, %232, %cst_92 [1] : vector<8x32xf32> to vector<8xf32>
    %234 = vector.shape_cast %233 : vector<8xf32> to vector<8x1xf32>
    %cst_93 = arith.constant 3.200000e+01 : f32
    %235 = vector.broadcast %cst_93 : f32 to vector<8x1xf32>
    %236 = arith.divf %234, %235 : vector<8x1xf32>
    %237 = vector.broadcast %236 : vector<8x1xf32> to vector<8x32xf32>
    %238 = arith.subf %232, %237 : vector<8x32xf32>
    %239 = arith.mulf %238, %238 : vector<8x32xf32>
    %cst_94 = arith.constant dense<0.000000e+00> : vector<8xf32>
    %240 = vector.multi_reduction <add>, %239, %cst_94 [1] : vector<8x32xf32> to vector<8xf32>
    %241 = vector.shape_cast %240 : vector<8xf32> to vector<8x1xf32>
    %cst_95 = arith.constant 3.200000e+01 : f32
    %242 = vector.broadcast %cst_95 : f32 to vector<8x1xf32>
    %243 = arith.divf %241, %242 : vector<8x1xf32>
    %cst_96 = arith.constant 9.99999996E-13 : f32
    %244 = vector.broadcast %cst_96 : f32 to vector<8x1xf32>
    %245 = arith.addf %243, %244 : vector<8x1xf32>
    %246 = math.rsqrt %245 : vector<8x1xf32>
    %247 = vector.broadcast %246 : vector<8x1xf32> to vector<8x32xf32>
    %248 = arith.mulf %238, %247 : vector<8x32xf32>
    %249 = vector.broadcast %144 : vector<1x32xf32> to vector<8x32xf32>
    %250 = arith.mulf %248, %249 : vector<8x32xf32>
    %251 = vector.broadcast %145 : vector<1x32xf32> to vector<8x32xf32>
    %252 = arith.addf %250, %251 : vector<8x32xf32>
    %253 = arith.truncf %252 : vector<8x32xf32> to vector<8x32xbf16>
    %c0_97 = arith.constant 0 : index
    %c0_98 = arith.constant 0 : index
    %254 = vector.load %arg10[%c0_97, %c0_98] : memref<32x32xbf16, #tpu.memory_space<vmem>>, vector<32x32xbf16>
    %cst_99 = arith.constant dense<0.000000e+00> : vector<8x32xf32>
    %255 = tpu.matmul %253, %254, %cst_99 {dimension_numbers = #tpu.dot_dimension_numbers<[1], [0], [0], [1], [0, 0, 1, 1], [], []>} : vector<8x32xbf16>, vector<32x32xbf16>, vector<8x32xf32> -> vector<8x32xf32>
    %256 = vector.extract_strided_slice %0 {offsets = [2, 0], sizes = [1, 32], strides = [1, 1]} : vector<16x32xf32> to vector<1x32xf32>
    %257 = vector.broadcast %256 : vector<1x32xf32> to vector<8x32xf32>
    %258 = arith.addf %255, %257 : vector<8x32xf32>
    %259 = math.tanh %258 : vector<8x32xf32>
    %260 = arith.truncf %259 : vector<8x32xf32> to vector<8x32xbf16>
    %c0_100 = arith.constant 0 : index
    %c0_101 = arith.constant 0 : index
    %261 = vector.load %arg11[%c0_100, %c0_101] : memref<32x128xbf16, #tpu.memory_space<vmem>>, vector<32x128xbf16>
    %cst_102 = arith.constant dense<0.000000e+00> : vector<8x128xf32>
    %262 = tpu.matmul %260, %261, %cst_102 {dimension_numbers = #tpu.dot_dimension_numbers<[1], [0], [0], [1], [0, 0, 1, 1], [], []>} : vector<8x32xbf16>, vector<32x128xbf16>, vector<8x128xf32> -> vector<8x128xf32>
    %c0_103 = arith.constant 0 : index
    %c0_104 = arith.constant 0 : index
    %263 = vector.load %arg12[%c0_103, %c0_104] : memref<1x128xf32, #tpu.memory_space<vmem>>, vector<1x128xf32>
    %264 = vector.broadcast %263 : vector<1x128xf32> to vector<8x128xf32>
    %265 = arith.addf %262, %264 : vector<8x128xf32>
    %c0_105 = arith.constant 0 : index
    %c0_106 = arith.constant 0 : index
    %266 = vector.load %arg13[%c0_105, %c0_106] : memref<8x128xf32, #tpu.memory_space<vmem>>, vector<8x128xf32>
    tpu.vector_store %arg13[%c0_105, %c0_106], %265 {strides = array<i32>} : memref<8x128xf32, #tpu.memory_space<vmem>>, vector<8x128xf32>,
    return
  }
  func.func @transform_0(%arg0: i32) -> (i32, i32) {
    %c0_i32 = arith.constant 0 : i32
    %c0_i32_0 = arith.constant 0 : i32
    return %arg0, %c0_i32 : i32, i32
  }
  func.func @transform_1(%arg0: i32) -> (i32, i32, i32) {
    %c0_i32 = arith.constant 0 : i32
    %c0_i32_0 = arith.constant 0 : i32
    %c0_i32_1 = arith.constant 0 : i32
    return %arg0, %c0_i32, %c0_i32_0 : i32, i32, i32
  }
  func.func @transform_2(%arg0: i32) -> (i32, i32) {
    %c0_i32 = arith.constant 0 : i32
    %c0_i32_0 = arith.constant 0 : i32
    %c0_i32_1 = arith.constant 0 : i32
    return %c0_i32, %c0_i32_0 : i32, i32
  }
  func.func @transform_3(%arg0: i32) -> (i32, i32, i32) {
    %c0_i32 = arith.constant 0 : i32
    %c0_i32_0 = arith.constant 0 : i32
    %c0_i32_1 = arith.constant 0 : i32
    %c0_i32_2 = arith.constant 0 : i32
    return %c0_i32, %c0_i32_0, %c0_i32_1 : i32, i32, i32
  }
  func.func @transform_4(%arg0: i32) -> (i32, i32, i32, i32) {
    %c0_i32 = arith.constant 0 : i32
    %c0_i32_0 = arith.constant 0 : i32
    %c0_i32_1 = arith.constant 0 : i32
    %c0_i32_2 = arith.constant 0 : i32
    %c0_i32_3 = arith.constant 0 : i32
    return %c0_i32, %c0_i32_0, %c0_i32_1, %c0_i32_2 : i32, i32, i32, i32
  }
  func.func @transform_5(%arg0: i32) -> (i32, i32, i32, i32) {
    %c0_i32 = arith.constant 0 : i32
    %c0_i32_0 = arith.constant 0 : i32
    %c0_i32_1 = arith.constant 0 : i32
    %c0_i32_2 = arith.constant 0 : i32
    %c0_i32_3 = arith.constant 0 : i32
    return %c0_i32, %c0_i32_0, %c0_i32_1, %c0_i32_2 : i32, i32, i32, i32
  }
  func.func @transform_6(%arg0: i32) -> (i32, i32, i32, i32) {
    %c0_i32 = arith.constant 0 : i32
    %c0_i32_0 = arith.constant 0 : i32
    %c0_i32_1 = arith.constant 0 : i32
    %c0_i32_2 = arith.constant 0 : i32
    %c0_i32_3 = arith.constant 0 : i32
    return %c0_i32, %c0_i32_0, %c0_i32_1, %c0_i32_2 : i32, i32, i32, i32
  }
  func.func @transform_7(%arg0: i32) -> (i32, i32, i32) {
    %c0_i32 = arith.constant 0 : i32
    %c0_i32_0 = arith.constant 0 : i32
    %c0_i32_1 = arith.constant 0 : i32
    %c0_i32_2 = arith.constant 0 : i32
    return %c0_i32, %c0_i32_0, %c0_i32_1 : i32, i32, i32
  }
  func.func @transform_8(%arg0: i32) -> (i32, i32, i32) {
    %c0_i32 = arith.constant 0 : i32
    %c0_i32_0 = arith.constant 0 : i32
    %c0_i32_1 = arith.constant 0 : i32
    %c0_i32_2 = arith.constant 0 : i32
    return %c0_i32, %c0_i32_0, %c0_i32_1 : i32, i32, i32
  }
  func.func @transform_9(%arg0: i32) -> (i32, i32) {
    %c0_i32 = arith.constant 0 : i32
    %c0_i32_0 = arith.constant 0 : i32
    %c0_i32_1 = arith.constant 0 : i32
    return %c0_i32, %c0_i32_0 : i32, i32
  }
  func.func @transform_10(%arg0: i32) -> (i32, i32) {
    %c0_i32 = arith.constant 0 : i32
    %c0_i32_0 = arith.constant 0 : i32
    %c0_i32_1 = arith.constant 0 : i32
    return %c0_i32, %c0_i32_0 : i32, i32
  }
  func.func @transform_11(%arg0: i32) -> (i32, i32) {
    %c0_i32 = arith.constant 0 : i32
    %c0_i32_0 = arith.constant 0 : i32
    %c0_i32_1 = arith.constant 0 : i32
    return %c0_i32, %c0_i32_0 : i32, i32
  }
  func.func @transform_12(%arg0: i32) -> (i32, i32) {
    %c0_i32 = arith.constant 0 : i32
    %c0_i32_0 = arith.constant 0 : i32
    return %arg0, %c0_i32 : i32, i32
  }
}

</mosaic_0001>

<bundles_post_ra>
// kernel: bert_classifier_forward.1
= control target key start
LH: loop header
LB: loop body
LE: loop exit
PB: predicated region body
PF: predicated region fallthrough
CT: control target
= control target key end

     0   :  { %s2941_s21 = smov 0   ;;  %s3442_s0 = inlined_call_operand.vmem [shape: f32[16,32], index: 0, kind: input, shape index: {}]   ;;  %s3443_s1 = inlined_call_operand.vmem [shape: f32[2,1,8], index: 1, kind: input, shape index: {}]   ;;  %s3444_s2 = inlined_call_operand.vmem [shape: f32[16,32], index: 2, kind: input, shape index: {}]   ;;  %s3445_s3 = inlined_call_operand.vmem [shape: f32[2,1,64], index: 3, kind: input, shape index: {}]   ;;  %s3446_s4 = inlined_call_operand.vmem [shape: bf16[2,12,32,8], index: 4, kind: input, shape index: {}]   ;;  %s3447_s5 = inlined_call_operand.vmem [shape: f32[2,12,1,8], index: 5, kind: input, shape index: {}]   ;;  %s3448_s6 = inlined_call_operand.vmem [shape: bf16[2,4,8,32], index: 6, kind: input, shape index: {}]   ;;  %s3449_s7 = inlined_call_operand.vmem [shape: bf16[2,32,64], index: 7, kind: input, shape index: {}]   ;;  %s3450_s8 = inlined_call_operand.vmem [shape: bf16[2,64,32], index: 8, kind: input, shape index: {}]   ;;  %s3451_s9 = inlined_call_operand.vmem [shape: bf16[32,32], index: 9, kind: input, shape index: {}]   ;;  %s3452_s10 = inlined_call_operand.vmem [shape: bf16[32,128], index: 10, kind: input, shape index: {}]   ;;  %s3453_s11 = inlined_call_operand.vmem [shape: f32[1,128], index: 11, kind: input, shape index: {}]   ;;  %s3454_s12 = inlined_call_operand.vmem [shape: f32[16,128], index: 12, kind: output, shape index: {}]  }
   0x1 LB: > { %s2319_s22 = sadd.s32 4294967295, %s2873_s21   ;;  %p2323_p0 = scmp.ge.s32.totalorder %s2873_s21, 1  ;;  %s2873_s21 = sphi %s2941_s21, %s22_s21  }
   0x2   : > { %p369_p1 = scmp.lt.s32.totalorder %s2873_s21, 3 }
   0x4   : > { %p370_p2 = pnand %p2323_p0, %p369_p1 }
   0x5   : > { %p412_p3 = scmp.lt.s32.totalorder (!%p370_p2), %s2319_s22, 1 }
   0x6   : > { %373 = sbr.rel (%p370_p2) target bundleno = 3870 (0xf1e), region = 68 }
   0xb   : > { %s3456_s22 = smov (!%p412_p3, %s2319_s22), 1  ;;  %vm427_vm0 = vcmask 261120   ;;  %v2875_v2 = vmov 32.0   ;;  %v2716_v14 = vld [vmem:[%s3446_s4 + $0x8] sm:$0xff]  ;;  %v2718_v15 = vld [vmem:[%s3446_s4 + $0x18] sm:$0xff]  ;;  %v2715_v18 = vld [vmem:[%s3446_s4] sm:$0xff] }
   0xc   : > { %s2324_s23 = sshll.u32 %s3456_s22, 3  ;;  %s418_s26 = scalar_lea.vmem %s3443_s1, %s3456_s22  ;;  %2816 = vrcp.f32 %v2875_v2  ;;  %v2720_v16 = vld [vmem:[%s3446_s4 + $0x28] sm:$0xff]  ;;  %v2722_v17 = vld [vmem:[%s3446_s4 + $0x38] sm:$0xff]  ;;  %583 = vmatpush.bf16.msra.mxu0 %v2716_v14  ;;  %608 = vmatpush.bf16.msra.mxu1 %v2718_v15  ;;  %v2717_v19 = vld [vmem:[%s3446_s4 + $0x10] sm:$0xff]  ;;  %vm873_vm5 = vcmask 64512   ;;  %vm1005_vm6 = vcmask 1043456  }
   0xd   : > { %s415_s29 = scalar_lea.vmem %s3442_s0, %s2324_s23  ;;  %633 = vmatpush.bf16.msra.mxu2 %v2720_v16  ;;  %658 = vmatpush.bf16.msra.mxu3 %v2722_v17  ;;  %v2719_v20 = vld [vmem:[%s3446_s4 + $0x20] sm:$0xff]  ;;  %v2721_v21 = vld [vmem:[%s3446_s4 + $0x30] sm:$0xff]  ;;  %v2724_v23 = vld [vmem:[%s3446_s4 + $0x48] sm:$0xff]  ;;  %vm1279_vm10 = vcmask 523264   ;;  %s422_s15 = scalar_lea.vmem %s3454_s12, %s2324_s23 }
   0xe   : > { %v426_v0 = vld [vmem:[%s415_s29] sm:$0xff]  ;;  %v2726_v24 = vld [vmem:[%s3446_s4 + $0x58] sm:$0xff]  ;;  %v2728_v25 = vld [vmem:[%s3446_s4 + $0x68] sm:$0xff] }
   0xf   : > { %v428_v1 = vsel %vm427_vm0, %v426_v0, 0.0  ;;  %v2730_v27 = vld [vmem:[%s3446_s4 + $0x78] sm:$0xff]  ;;  %v2723_v28 = vld [vmem:[%s3446_s4 + $0x40] sm:$0xff]  ;;  %v2725_v29 = vld [vmem:[%s3446_s4 + $0x50] sm:$0xff] }
  0x10   : > { %429 = vadd.xlane.f32.xlu0 %v428_v1  ;;  %584 = vmatpush.bf16.msra.mxu0 %v2715_v18  ;;  %v2727_v31 = vld [vmem:[%s3446_s4 + $0x60] sm:$0xff]  ;;  %v2729_v32 = vld [vmem:[%s3446_s4 + $0x70] sm:$0xff]  ;;  %v2732_v47 = vld [vmem:[%s3446_s4 + $0x88] sm:$0xff] }
  0x11   : > { %609 = vmatpush.bf16.msra.mxu1 %v2717_v19  ;;  %634 = vmatpush.bf16.msra.mxu2 %v2719_v20  ;;  %v3018_v37 = vld [vmem:[%s3444_s2] sm:$0xff]  ;;  %v2734_v48 = vld [vmem:[%s3446_s4 + $0x98] sm:$0xff]  ;;  %v2736_v49 = vld [vmem:[%s3446_s4 + $0xa8] sm:$0xff] }
  0x12   : > { %v2817_v3 = vpop.eup %2816  ;;  %659 = vmatpush.bf16.msra.mxu3 %v2721_v21  ;;  %v457_v40 = vperm.slane %v3018_v37, 0  ;;  %v459_v42 = vperm.slane %v3018_v37, 1  ;;  %v2738_v50 = vld [vmem:[%s3446_s4 + $0xb8] sm:$0xff]  ;;  %v2731_v51 = vld [vmem:[%s3446_s4 + $0x80] sm:$0xff]  ;;  %v2733_v52 = vld [vmem:[%s3446_s4 + $0x90] sm:$0xff] }
  0x13   : > { %v432_v4 = vmul.f32 32.0, %v2817_v3  ;;  %vm436_vm1 = vweird.f32 %v2817_v3  ;;  %v2735_v53 = vld [vmem:[%s3446_s4 + $0xa0] sm:$0xff]  ;;  %v2737_v54 = vld [vmem:[%s3446_s4 + $0xb0] sm:$0xff] }
  0x14   : > { %683 = vmatpush.bf16.msrb.mxu0 %v2724_v23  ;;  %v2793_v61 = vld [vmem:[%s3447_s5 + $0x4] ss:$0 sm:$0xff]  ;;  %v2794_v62 = vld [vmem:[%s3447_s5 + $0x5] ss:$0 sm:$0xff]  ;;  %v2792_v23 = vld [vmem:[%s3447_s5 + $0x3] ss:$0 sm:$0xff] }
  0x15   : > { %v433_v5 = vsub.f32 1.0, %v432_v4  ;;  %708 = vmatpush.bf16.msrb.mxu1 %v2726_v24  ;;  %733 = vmatpush.bf16.msrb.mxu2 %v2728_v25 }
  0x16   : > { %758 = vmatpush.bf16.msrb.mxu3 %v2730_v27 }
  0x17   : > { %v434_v6 = vmul.f32 %v2817_v3, %v433_v5  ;;  %v2789_v5 = vld [vmem:[%s3447_s5] ss:$0 sm:$0xff] }
  0x18   : > { %684 = vmatpush.bf16.msrb.mxu0 %v2723_v28 }
  0x19   : > { %v435_v7 = vadd.f32 %v2817_v3, %v434_v6  ;;  %709 = vmatpush.bf16.msrb.mxu1 %v2725_v29  ;;  %734 = vmatpush.bf16.msrb.mxu2 %v2727_v31  ;;  %v2798_v31 = vld [vmem:[%s3447_s5 + $0x9] ss:$0 sm:$0xff] }
  0x1a   : > { %759 = vmatpush.bf16.msrb.mxu3 %v2729_v32 }
  0x1b   : > { %v2962_v8 = vsel %vm436_vm1, %v2817_v3, %v435_v7 }
  0x83   : > { %v430_v9 = vpop.xlane.xlu0 %429 }
  0x84   : > { %v438_v10 = vmul.f32 %v2962_v8, %v430_v9  ;;  %v2790_v9 = vld [vmem:[%s3447_s5 + $0x1] ss:$0 sm:$0xff] }
  0x86   : > { %v439_v11 = vsub.f32 %v426_v0, %v438_v10  ;;  %v2795_v10 = vld [vmem:[%s3447_s5 + $0x6] ss:$0 sm:$0xff] }
  0x88   : > { %v440_v12 = vmul.f32 %v439_v11, %v439_v11 }
  0x8a   : > { %v441_v13 = vsel %vm427_vm0, %v440_v12, 0.0 }
  0x8b   : > { %442 = vadd.xlane.f32.xlu0 %v441_v13 }
  0xfe   : > { %v443_v22 = vpop.xlane.xlu0 %442 }
  0xff   : > { %v444_v26 = vmul.f32 %v443_v22, %v2962_v8  ;;  %v2791_v22 = vld [vmem:[%s3447_s5 + $0x2] ss:$0 sm:$0xff] }
 0x101   : > { %v445_v30 = vadd.f32 1e-12, %v444_v26 }
 0x103   : > { %2818 = vrsqrt.f32 %v445_v30  ;;  %vm452_vm3 = vweird.f32 %v445_v30 }
 0x109   : > { %v2819_v33 = vpop.eup %2818 }
 0x10a   : > { %v447_v34 = vmul.f32 %v2819_v33, %v445_v30  ;;  %vm453_vm2 = vweird.f32 %v2819_v33  ;;  %v2797_v30 = vld [vmem:[%s3447_s5 + $0x8] ss:$0 sm:$0xff] }
 0x10b   : > { %vm454_vm4 = vmor %vm452_vm3, %vm453_vm2 }
 0x10c   : > { %v448_v35 = vmul.f32 %v2819_v33, %v447_v34 }
 0x10e   : > { %v449_v36 = vmul.f32 0.5, %v448_v35 }
 0x110   : > { %v450_v38 = vsub.f32 1.5, %v449_v36 }
 0x112   : > { %v451_v39 = vmul.f32 %v2819_v33, %v450_v38 }
 0x114   : > { %v455_v41 = vsel %vm454_vm4, %v2819_v33, %v451_v39 }
 0x115   : > { %v456_v43 = vmul.f32 %v455_v41, %v439_v11  ;;  %v2796_v11 = vld [vmem:[%s3447_s5 + $0x7] ss:$0 sm:$0xff] }
 0x117   : > { %v458_v44 = vmul.f32 %v457_v40, %v456_v43 }
 0x119   : > { %v3022_v45 = vadd.f32 %v459_v42, %v458_v44 }
 0x11b   : > { %v465_v46 = vpack.c.bf16 %v3022_v45, %v3022_v45 }
 0x11d   : > { %2334 = vmatmul.msk.bf16.vlgmr.msra.gmra.mxu0 %vm427_vm0, %v465_v46  ;;  %2343 = vmatmul.msk.bf16.vlgmr.msra.gmra.mxu1 %vm427_vm0, %v465_v46 }
 0x11e   : > { %2352 = vmatmul.msk.bf16.vlgmr.msra.gmra.mxu2 %vm427_vm0, %v465_v46  ;;  %2361 = vmatmul.msk.bf16.vlgmr.msra.gmra.mxu3 %vm427_vm0, %v465_v46 }
 0x11f   : > { %783 = vmatpush.bf16.msra.mxu0 %v2732_v47  ;;  %808 = vmatpush.bf16.msra.mxu1 %v2734_v48  ;;  %v2800_v47 = vld [vmem:[%s3447_s5 + $0xb] ss:$0 sm:$0xff] }
 0x120   : > { %833 = vmatpush.bf16.msra.mxu2 %v2736_v49  ;;  %858 = vmatpush.bf16.msra.mxu3 %v2738_v50 }
 0x123   : > { %784 = vmatpush.bf16.msra.mxu0 %v2731_v51  ;;  %809 = vmatpush.bf16.msra.mxu1 %v2733_v52 }
 0x124   : > { %834 = vmatpush.bf16.msra.mxu2 %v2735_v53  ;;  %859 = vmatpush.bf16.msra.mxu3 %v2737_v54 }
 0x12d   : > { %2370 = vmatmul.msk.bf16.vlgmr.msrb.gmra.mxu0 %vm427_vm0, %v465_v46  ;;  %2379 = vmatmul.msk.bf16.vlgmr.msrb.gmra.mxu1 %vm427_vm0, %v465_v46 }
 0x12e   : > { %2388 = vmatmul.msk.bf16.vlgmr.msrb.gmra.mxu2 %vm427_vm0, %v465_v46  ;;  %2397 = vmatmul.msk.bf16.vlgmr.msrb.gmra.mxu3 %vm427_vm0, %v465_v46 }
 0x13d   : > { %2406 = vmatmul.msk.bf16.vlgmr.msra.gmra.mxu0 %vm427_vm0, %v465_v46  ;;  %2415 = vmatmul.msk.bf16.vlgmr.msra.gmra.mxu1 %vm427_vm0, %v465_v46 }
 0x13e   : > { %2424 = vmatmul.msk.bf16.vlgmr.msra.gmra.mxu2 %vm427_vm0, %v465_v46  ;;  %2433 = vmatmul.msk.bf16.vlgmr.msra.gmra.mxu3 %vm427_vm0, %v465_v46  ;;  %v2799_v46 = vld [vmem:[%s3447_s5 + $0xa] ss:$0 sm:$0xff] }
 0x19a   : > { %v586_v55 = vpop.f32.mrf.mxu0  ;;  %v611_v56 = vpop.f32.mrf.mxu1 }
 0x19b   : > { %v587_v16 = vadd.f32 %v2789_v5, %v586_v55  ;;  %v612_v17 = vadd.f32 %v2790_v9, %v611_v56 }
 0x19d   : > { %v865_v26 = vpack.c.bf16 %v587_v16, %v587_v16  ;;  %v866_v27 = vpack.c.bf16 %v612_v17, %v612_v17 }
 0x1a1   : > { %v636_v57 = vpop.f32.mrf.mxu2  ;;  %v661_v58 = vpop.f32.mrf.mxu3 }
 0x1a2   : > { %v588_v59 = vpop.f32.mrf.mxu0  ;;  %v613_v60 = vpop.f32.mrf.mxu1  ;;  %v637_v32 = vadd.f32 %v2791_v22, %v636_v57  ;;  %v662_v33 = vadd.f32 %v2792_v23, %v661_v58 }
 0x1a4   : > { %v867_v41 = vpack.c.bf16 %v637_v32, %v637_v32  ;;  %v868_v42 = vpack.c.bf16 %v662_v33, %v662_v33 }
 0x1a9   : > { %v638_v63 = vpop.f32.mrf.mxu2  ;;  %v663_v0 = vpop.f32.mrf.mxu3 }
 0x1aa   : > { %v686_v1 = vpop.f32.mrf.mxu0  ;;  %v711_v2 = vpop.f32.mrf.mxu1 }
 0x1ab   : > { %v687_v3 = vadd.f32 %v2793_v61, %v686_v1  ;;  %v712_v4 = vadd.f32 %v2794_v62, %v711_v2  ;;  %v3115_v62 = vld [vmem:[%s418_s26] ss:$0 sm:$0xff] }
 0x1ad   : > { %v869_v6 = vpack.c.bf16 %v687_v3, %v687_v3  ;;  %v870_v7 = vpack.c.bf16 %v712_v4, %v712_v4 }
 0x1af   : > { %v878_v12 = vsel %vm873_vm5, %v869_v6, 0  ;;  %v897_v13 = vsel %vm873_vm5, %v870_v7, 0 }
 0x1b0   : > { %887 = vmatpush.bf16.xpose.msrb.mxu0 %v878_v12  ;;  %906 = vmatpush.bf16.xpose.msrb.mxu1 %v897_v13 }
 0x1b1   : > { %v736_v14 = vpop.f32.mrf.mxu2  ;;  %v761_v15 = vpop.f32.mrf.mxu3 }
 0x1b2   : > { %v737_v18 = vadd.f32 %v2795_v10, %v736_v14  ;;  %v762_v19 = vadd.f32 %v2796_v11, %v761_v15  ;;  %v688_v20 = vpop.f32.mrf.mxu0  ;;  %v713_v21 = vpop.f32.mrf.mxu1 }
 0x1b4   : > { %v871_v24 = vpack.c.bf16 %v737_v18, %v737_v18  ;;  %v872_v25 = vpack.c.bf16 %v762_v19, %v762_v19 }
 0x1b6   : > { %v916_v28 = vsel %vm873_vm5, %v871_v24, 0  ;;  %v935_v29 = vsel %vm873_vm5, %v872_v25, 0 }
 0x1b7   : > { %925 = vmatpush.bf16.xpose.msrb.mxu2 %v916_v28  ;;  %944 = vmatpush.bf16.xpose.msrb.mxu3 %v935_v29 }
 0x1b8   : > { %2434 = vmatmul.msk.bf16.vlgmr.msrb.gmra.mxu0 %vm873_vm5, %v865_v26  ;;  %2435 = vmatmul.msk.bf16.vlgmr.msrb.gmra.mxu1 %vm873_vm5, %v866_v27 }
 0x1b9   : > { %v738_v34 = vpop.f32.mrf.mxu2  ;;  %v763_v35 = vpop.f32.mrf.mxu3 }
 0x1ba   : > { %v786_v36 = vpop.f32.mrf.mxu0  ;;  %v811_v38 = vpop.f32.mrf.mxu1 }
 0x1bb   : > { %v787_v39 = vadd.f32 %v2797_v30, %v786_v36  ;;  %v812_v40 = vadd.f32 %v2798_v31, %v811_v38 }
 0x1bd   : > { %v998_v43 = vpack.c.bf16 %v787_v39, %v787_v39  ;;  %v999_v44 = vpack.c.bf16 %v812_v40, %v812_v40 }
 0x1be   : > { %2436 = vmatmul.msk.bf16.vlgmr.msrb.gmra.mxu2 %vm873_vm5, %v867_v41  ;;  %2437 = vmatmul.msk.bf16.vlgmr.msrb.gmra.mxu3 %vm873_vm5, %v868_v42 }
 0x1bf   : > { %v1007_v48 = vsel %vm1005_vm6, %v998_v43, 0  ;;  %v1026_v49 = vsel %vm1005_vm6, %v999_v44, 0 }
 0x1c0   : > { %1016 = vmatpush.bf16.msra.mxu0 %v1007_v48  ;;  %1035 = vmatpush.bf16.msra.mxu1 %v1026_v49 }
 0x1c1   : > { %v836_v50 = vpop.f32.mrf.mxu2  ;;  %v861_v51 = vpop.f32.mrf.mxu3 }
 0x1c2   : > { %v837_v52 = vadd.f32 %v2799_v46, %v836_v50  ;;  %v862_v53 = vadd.f32 %v2800_v47, %v861_v51  ;;  %v788_v54 = vpop.f32.mrf.mxu0  ;;  %v813_v55 = vpop.f32.mrf.mxu1 }
 0x1c3   : > { %v1083_v54 = vld [vmem:[%s3448_s6] sm:$0xf] }
 0x1c4   : > { %v1000_v56 = vpack.c.bf16 %v837_v52, %v837_v52  ;;  %v1001_v57 = vpack.c.bf16 %v862_v53, %v862_v53  ;;  %v1091_v55 = vsel %vm1005_vm6, %v1083_v54, 0 }
 0x1c5   : > { %1100 = vmatpush.bf16.msrb.mxu0 %v1091_v55  ;;  %v2744_v55 = vld [vmem:[%s3450_s8 + $0x18] sm:$0xff] }
 0x1c6   : > { %v1045_v58 = vsel %vm1005_vm6, %v1000_v56, 0  ;;  %v1064_v59 = vsel %vm1005_vm6, %v1001_v57, 0  ;;  %v1085_v56 = vld [vmem:[%s3448_s6 + $0x8] sm:$0xf] }
 0x1c7   : > { %1054 = vmatpush.bf16.msra.mxu2 %v1045_v58  ;;  %1073 = vmatpush.bf16.msra.mxu3 %v1064_v59  ;;  %v1129_v57 = vsel %vm1005_vm6, %v1085_v56, 0  ;;  %v1084_v58 = vld [vmem:[%s3448_s6 + $0x4] sm:$0xf]  ;;  %v2743_v56 = vld [vmem:[%s3450_s8 + $0x10] sm:$0xff] }
 0x1c8   : > { %v1110_v59 = vsel %vm1005_vm6, %v1084_v58, 0  ;;  %v2741_v58 = vld [vmem:[%s3450_s8] sm:$0xff] }
 0x1c9   : > { %v838_v60 = vpop.f32.mrf.mxu2  ;;  %v863_v61 = vpop.f32.mrf.mxu3  ;;  %1119 = vmatpush.bf16.msrb.mxu1 %v1110_v59  ;;  %v2801_v59 = vld [vmem:[%s3445_s3] ss:$0 sm:$0xff] }
 0x1ca   : > { %v1086_v60 = vld [vmem:[%s3448_s6 + $0xc] sm:$0xf] }
 0x1cb   : > { %1138 = vmatpush.bf16.msrb.mxu2 %v1129_v57  ;;  %v1148_v61 = vsel %vm1005_vm6, %v1086_v60, 0  ;;  %v2742_v57 = vld [vmem:[%s3450_s8 + $0x8] sm:$0xff] }
 0x1cc   : > { %1157 = vmatpush.bf16.msrb.mxu3 %v1148_v61 }
 0x235   : > { %v889_v63 = vpop.f32.mrf.mxu0  ;;  %v908_v0 = vpop.f32.mrf.mxu1 }
 0x236   : > { %v890_v1 = vadd.f32 %v3115_v62, %v889_v63  ;;  %v909_v3 = vadd.f32 %v3115_v62, %v908_v0 }
 0x238   : > { %v950_v2 = vsel %vm873_vm5, %v890_v1, -inf  ;;  %v953_v6 = vsel %vm873_vm5, %v909_v3, -inf }
 0x239   : > { %951 = vmax.xlane.f32.xlu2 %v950_v2 }
 0x23d   : > { %v891_v4 = vpop.f32.mrf.mxu0  ;;  %v910_v5 = vpop.f32.mrf.mxu1 }
 0x241   : > { %v927_v7 = vpop.f32.mrf.mxu2  ;;  %v946_v9 = vpop.f32.mrf.mxu3  ;;  %954 = vmax.xlane.f32.xlu2 %v953_v6 }
 0x242   : > { %v928_v10 = vadd.f32 %v3115_v62, %v927_v7  ;;  %v947_v12 = vadd.f32 %v3115_v62, %v946_v9 }
 0x244   : > { %v956_v11 = vsel %vm873_vm5, %v928_v10, -inf  ;;  %v959_v15 = vsel %vm873_vm5, %v947_v12, -inf }
 0x245   : > { %957 = vmax.xlane.f32.xlu1 %v956_v11 }
 0x249   : > { %v929_v13 = vpop.f32.mrf.mxu2  ;;  %v948_v14 = vpop.f32.mrf.mxu3 }
 0x24d   : > { %960 = vmax.xlane.f32.xlu1 %v959_v15 }
 0x2ac   : > { %v952_v16 = vpop.xlane.xlu2 %951 }
 0x2ad   : > { %v962_v17 = vsub.f32 %v890_v1, %v952_v16 }
 0x2af   : > { %v966_v18 = vmul.f32 1.442695, %v962_v17 }
 0x2b1   : > { %2820 = vpow2.f32 %v966_v18 }
 0x2b4   : > { %v955_v20 = vpop.xlane.xlu2 %954 }
 0x2b5   : > { %v963_v24 = vsub.f32 %v909_v3, %v955_v20 }
 0x2b7   : > { %v2821_v19 = vpop.eup %2820  ;;  %v968_v26 = vmul.f32 1.442695, %v963_v24  ;;  %v1170_v24 = vperm.slane %v3018_v37, 3 }
 0x2b8   : > { %v958_v21 = vpop.xlane.xlu1 %957  ;;  %v974_v22 = vsel %vm873_vm5, %v2821_v19, 0.0 }
 0x2b9   : > { %v964_v23 = vsub.f32 %v928_v10, %v958_v21  ;;  %975 = vadd.xlane.f32.xlu2 %v974_v22 }
 0x2bb   : > { %v970_v25 = vmul.f32 1.442695, %v964_v23 }
 0x2bd   : > { %2822 = vpow2.f32 %v970_v25 }
 0x2be   : > { %2824 = vpow2.f32 %v968_v26 }
 0x2c0   : > { %v961_v27 = vpop.xlane.xlu1 %960 }
 0x2c1   : > { %v965_v28 = vsub.f32 %v947_v12, %v961_v27 }
 0x2c3   : > { %v2823_v29 = vpop.eup %2822  ;;  %v972_v30 = vmul.f32 1.442695, %v965_v28 }
 0x2c4   : > { %v980_v31 = vsel %vm873_vm5, %v2823_v29, 0.0  ;;  %v2825_v32 = vpop.eup %2824 }
 0x2c5   : > { %2826 = vpow2.f32 %v972_v30  ;;  %981 = vadd.xlane.f32.xlu0 %v980_v31  ;;  %v977_v35 = vsel %vm873_vm5, %v2825_v32, 0.0 }
 0x2cb   : > { %v2827_v33 = vpop.eup %2826 }
 0x2cc   : > { %v983_v34 = vsel %vm873_vm5, %v2827_v33, 0.0 }
 0x2cd   : > { %984 = vadd.xlane.f32.xlu1 %v983_v34  ;;  %978 = vadd.xlane.f32.xlu0 %v977_v35 }
 0x32c   : > { %v976_v36 = vpop.xlane.xlu2 %975 }
 0x32d   : > { %2828 = vrcp.f32 %v976_v36  ;;  %v2740_v36 = vld [vmem:[%s3449_s7 + $0x8] sm:$0xff] }
 0x333   : > { %v2829_v38 = vpop.eup %2828 }
 0x334   : > { %v990_v39 = vmul.f32 %v2829_v38, %v2821_v19 }
 0x336   : > { %v994_v40 = vpack.c.bf16 %v990_v39, %v990_v39 }
 0x338   : > { %v982_v41 = vpop.xlane.xlu0 %981  ;;  %2438 = vmatmul.msk.bf16.vlgmr.msra.gmra.mxu0 %vm873_vm5, %v994_v40 }
 0x339   : > { %2830 = vrcp.f32 %v982_v41  ;;  %1229 = vmatpush.bf16.msra.mxu0 %v2740_v36  ;;  %v2753_v36 = vld [vmem:[%s3446_s4 + $0x100] sm:$0xff] }
 0x33f   : > { %v2831_v42 = vpop.eup %2830 }
 0x340   : > { %v992_v43 = vmul.f32 %v2831_v42, %v2823_v29  ;;  %v985_v44 = vpop.xlane.xlu1 %984  ;;  %v979_v46 = vpop.xlane.xlu0 %978 }
 0x341   : > { %2832 = vrcp.f32 %v985_v44 }
 0x342   : > { %v996_v47 = vpack.c.bf16 %v992_v43, %v992_v43  ;;  %2834 = vrcp.f32 %v979_v46 }
 0x344   : > { %2440 = vmatmul.msk.bf16.vlgmr.msra.gmra.mxu2 %vm873_vm5, %v996_v47 }
 0x347   : > { %v2833_v48 = vpop.eup %2832 }
 0x348   : > { %v2835_v49 = vpop.eup %2834  ;;  %v993_v50 = vmul.f32 %v2833_v48, %v2827_v33  ;;  %v1195_v48 = vperm.slane %v3018_v37, 4 }
 0x349   : > { %v991_v51 = vmul.f32 %v2835_v49, %v2825_v32 }
 0x34a   : > { %v997_v52 = vpack.c.bf16 %v993_v50, %v993_v50  ;;  %v1197_v50 = vperm.slane %v3018_v37, 5 }
 0x34b   : > { %v995_v53 = vpack.c.bf16 %v991_v51, %v991_v51 }
 0x34c   : > { %2441 = vmatmul.msk.bf16.vlgmr.msra.gmra.mxu3 %vm873_vm5, %v997_v52 }
 0x34d   : > { %2439 = vmatmul.msk.bf16.vlgmr.msra.gmra.mxu1 %vm873_vm5, %v995_v53 }
 0x34e   : > { %1287 = vmatpush.bf16.msra.mxu1 %v2744_v55 }
 0x352   : > { %1288 = vmatpush.bf16.msra.mxu1 %v2743_v56  ;;  %v2762_v56 = vld [vmem:[%s3446_s4 + $0x148] sm:$0xff] }
 0x356   : > { %1289 = vmatpush.bf16.msra.mxu1 %v2742_v57  ;;  %v2764_v57 = vld [vmem:[%s3446_s4 + $0x158] sm:$0xff] }
 0x35a   : > { %1290 = vmatpush.bf16.msra.mxu1 %v2741_v58  ;;  %v2768_v58 = vld [vmem:[%s3446_s4 + $0x178] sm:$0xff] }
 0x3b5   : > { %v1018_v63 = vpop.f32.mrf.mxu0 }
 0x3b6   : > { %v1079_v0 = vpack.c.bf16 %v1018_v63, %v1018_v63 }
 0x3b8   : > { %2442 = vmatmul.msk.bf16.vlgmr.msrb.gmra.mxu0 %vm873_vm5, %v1079_v0 }
 0x3bd   : > { %v1020_v1 = vpop.f32.mrf.mxu0 }
 0x3c7   : > { %v1056_v2 = vpop.f32.mrf.mxu2 }
 0x3c8   : > { %v1081_v3 = vpack.c.bf16 %v1056_v2, %v1056_v2 }
 0x3ca   : > { %v1037_v4 = vpop.f32.mrf.mxu1  ;;  %2444 = vmatmul.msk.bf16.vlgmr.msrb.gmra.mxu2 %vm873_vm5, %v1081_v3 }
 0x3cb   : > { %v1080_v5 = vpack.c.bf16 %v1037_v4, %v1037_v4 }
 0x3cd   : > { %2443 = vmatmul.msk.bf16.vlgmr.msrb.gmra.mxu1 %vm873_vm5, %v1080_v5 }
 0x3cf   : > { %v1058_v6 = vpop.f32.mrf.mxu2  ;;  %v1075_v7 = vpop.f32.mrf.mxu3 }
 0x3d0   : > { %v1082_v9 = vpack.c.bf16 %v1075_v7, %v1075_v7 }
 0x3d2   : > { %v1039_v10 = vpop.f32.mrf.mxu1  ;;  %2445 = vmatmul.msk.bf16.vlgmr.msrb.gmra.mxu3 %vm873_vm5, %v1082_v9 }
 0x3d7   : > { %v1077_v11 = vpop.f32.mrf.mxu3 }
 0x3d8   : > { %v1254_v11 = vperm.slane %v3018_v37, 6 }
 0x435   : > { %v1102_v12 = vpop.f32.mrf.mxu0 }
 0x436   : > { %v1163_v17 = vsel %vm427_vm0, %v1102_v12, 0.0 }
 0x43d   : > { %v1104_v13 = vpop.f32.mrf.mxu0 }
 0x44a   : > { %v1121_v14 = vpop.f32.mrf.mxu1 }
 0x44b   : > { %v1164_v16 = vsel %vm427_vm0, %v1121_v14, 0.0 }
 0x44c   : > { %v1165_v20 = vadd.f32 %v1164_v16, %v1163_v17 }
 0x44d   : > { %v1140_v15 = vpop.f32.mrf.mxu2 }
 0x44e   : > { %v1166_v18 = vsel %vm427_vm0, %v1140_v15, 0.0 }
 0x44f   : > { %v1167_v21 = vadd.f32 %v1166_v18, %v1165_v20 }
 0x452   : > { %v1123_v19 = vpop.f32.mrf.mxu1 }
 0x455   : > { %v1142_v22 = vpop.f32.mrf.mxu2  ;;  %v1159_v23 = vpop.f32.mrf.mxu3 }
 0x456   : > { %v1168_v25 = vsel %vm427_vm0, %v1159_v23, 0.0  ;;  %v2746_v22 = vld [vmem:[%s3446_s4 + $0xc8] sm:$0xff]  ;;  %v2748_v23 = vld [vmem:[%s3446_s4 + $0xd8] sm:$0xff] }
 0x457   : > { %v1169_v26 = vadd.f32 %v1168_v25, %v1167_v21  ;;  %v2752_v25 = vld [vmem:[%s3446_s4 + $0xf8] sm:$0xff]  ;;  %1443 = vmatpush.bf16.msra.mxu2 %v2746_v22  ;;  %1468 = vmatpush.bf16.msra.mxu3 %v2748_v23 }
 0x458   : > { %1518 = vmatpush.bf16.msrb.mxu1 %v2752_v25 }
 0x459   : > { %v1171_v27 = vadd.f32 %v1170_v24, %v1169_v26  ;;  %v2750_v24 = vld [vmem:[%s3446_s4 + $0xe8] sm:$0xff]  ;;  %v2745_v26 = vld [vmem:[%s3446_s4 + $0xc0] sm:$0xff] }
 0x45b   : > { %v1172_v28 = vadd.f32 %v1171_v27, %v3022_v45  ;;  %v2739_v45 = vld [vmem:[%s3449_s7] sm:$0xff]  ;;  %v2747_v27 = vld [vmem:[%s3446_s4 + $0xd0] sm:$0xff]  ;;  %1444 = vmatpush.bf16.msra.mxu2 %v2745_v26 }
 0x45c   : > { %1230 = vmatpush.bf16.msra.mxu0 %v2739_v45  ;;  %1469 = vmatpush.bf16.msra.mxu3 %v2747_v27  ;;  %v2755_v45 = vld [vmem:[%s3446_s4 + $0x110] sm:$0xff] }
 0x45d   : > { %v1161_v29 = vpop.f32.mrf.mxu3  ;;  %v1173_v30 = vsel %vm427_vm0, %v1172_v28, 0.0 }
 0x45e   : > { %1174 = vadd.xlane.f32.xlu1 %v1173_v30  ;;  %v2751_v29 = vld [vmem:[%s3446_s4 + $0xf0] sm:$0xff] }
 0x45f   : > { %1519 = vmatpush.bf16.msrb.mxu1 %v2751_v29  ;;  %v2804_v29 = vld [vmem:[%s3447_s5 + $0xc] ss:$0 sm:$0xff] }
 0x460   : > { %1493 = vmatpush.bf16.msrb.mxu0 %v2750_v24 }
 0x4d1   : > { %v1175_v31 = vpop.xlane.xlu1 %1174 }
 0x4d2   : > { %v1176_v32 = vmul.f32 %v1175_v31, %v2962_v8  ;;  %v2754_v31 = vld [vmem:[%s3446_s4 + $0x108] sm:$0xff] }
 0x4d3   : > { %1543 = vmatpush.bf16.msrb.mxu2 %v2754_v31 }
 0x4d4   : > { %v1177_v33 = vsub.f32 %v1172_v28, %v1176_v32  ;;  %v2749_v28 = vld [vmem:[%s3446_s4 + $0xe0] sm:$0xff]  ;;  %v2756_v32 = vld [vmem:[%s3446_s4 + $0x118] sm:$0xff] }
 0x4d5   : > { %1494 = vmatpush.bf16.msrb.mxu0 %v2749_v28  ;;  %1568 = vmatpush.bf16.msrb.mxu3 %v2756_v32 }
 0x4d6   : > { %v1178_v34 = vmul.f32 %v1177_v33, %v1177_v33 }
 0x4d7   : > { %1544 = vmatpush.bf16.msrb.mxu2 %v2753_v36 }
 0x4d8   : > { %v1179_v35 = vsel %vm427_vm0, %v1178_v34, 0.0 }
 0x4d9   : > { %1180 = vadd.xlane.f32.xlu2 %v1179_v35  ;;  %v2760_v35 = vld [vmem:[%s3446_s4 + $0x138] sm:$0xff]  ;;  %1569 = vmatpush.bf16.msrb.mxu3 %v2755_v45 }
 0x54c   : > { %v1181_v38 = vpop.xlane.xlu2 %1180 }
 0x54d   : > { %v1182_v39 = vmul.f32 %v1181_v38, %v2962_v8 }
 0x54f   : > { %v1183_v40 = vadd.f32 1e-12, %v1182_v39  ;;  %v2757_v39 = vld [vmem:[%s3446_s4 + $0x120] sm:$0xff] }
 0x551   : > { %2836 = vrsqrt.f32 %v1183_v40  ;;  %vm1190_vm8 = vweird.f32 %v1183_v40 }
 0x557   : > { %v2837_v41 = vpop.eup %2836 }
 0x558   : > { %v1185_v42 = vmul.f32 %v2837_v41, %v1183_v40  ;;  %vm1191_vm7 = vweird.f32 %v2837_v41  ;;  %v2759_v40 = vld [vmem:[%s3446_s4 + $0x130] sm:$0xff] }
 0x559   : > { %vm1192_vm9 = vmor %vm1190_vm8, %vm1191_vm7 }
 0x55a   : > { %v1186_v43 = vmul.f32 %v2837_v41, %v1185_v42 }
 0x55c   : > { %v1187_v44 = vmul.f32 0.5, %v1186_v43 }
 0x55e   : > { %v1188_v46 = vsub.f32 1.5, %v1187_v44 }
 0x560   : > { %v1189_v47 = vmul.f32 %v2837_v41, %v1188_v46 }
 0x562   : > { %v1193_v49 = vsel %vm1192_vm9, %v2837_v41, %v1189_v47  ;;  %v3244_v47 = vld [vmem:[%s3444_s2 + $0x8] sm:$0xff] }
 0x563   : > { %v1194_v51 = vmul.f32 %v1193_v49, %v1177_v33  ;;  %v2758_v33 = vld [vmem:[%s3446_s4 + $0x128] sm:$0xff]  ;;  %v1319_v49 = vperm.slane %v3018_v37, 7 }
 0x564   : > { %v2766_v37 = vld [vmem:[%s3446_s4 + $0x168] sm:$0xff] }
 0x565   : > { %v1196_v52 = vmul.f32 %v1195_v48, %v1194_v51  ;;  %v1321_v51 = vperm.slane %v3244_v47, 0 }
 0x567   : > { %v1198_v53 = vadd.f32 %v1197_v50, %v1196_v52 }
 0x569   : > { %v1199_v54 = vpack.c.bf16 %v1198_v53, %v1198_v53 }
 0x56b   : > { %2454 = vmatmul.msk.bf16.vlgmr.msra.gmra.mxu0 %vm427_vm0, %v1199_v54 }
 0x56c   : > { %1593 = vmatpush.bf16.msra.mxu0 %v2758_v33 }
 0x570   : > { %1594 = vmatpush.bf16.msra.mxu0 %v2757_v39 }
 0x5e8   : > { %v1232_v60 = vpop.f32.mrf.mxu0 }
 0x5e9   : > { %v1233_v61 = vadd.f32 %v2801_v59, %v1232_v60  ;;  %v2761_v59 = vld [vmem:[%s3446_s4 + $0x140] sm:$0xff]  ;;  %v2763_v60 = vld [vmem:[%s3446_s4 + $0x150] sm:$0xff] }
 0x5eb   : > { %v1237_v63 = vmul.f32 0.044715, %v1233_v61  ;;  %v1236_v6 = vmul.f32 0.5, %v1233_v61 }
 0x5ed   : > { %v1238_v0 = vmul.f32 %v1237_v63, %v1233_v61  ;;  %v2767_v63 = vld [vmem:[%s3446_s4 + $0x170] sm:$0xff] }
 0x5ef   : > { %v1239_v1 = vmul.f32 %v1238_v0, %v1233_v61 }
 0x5f0   : > { %v1234_v2 = vpop.f32.mrf.mxu0 }
 0x5f1   : > { %v1240_v3 = vadd.f32 %v1239_v1, %v1233_v61  ;;  %v2765_v61 = vld [vmem:[%s3446_s4 + $0x160] sm:$0xff] }
 0x5f3   : > { %v1241_v4 = vmul.f32 0.7978846, %v1240_v3 }
 0x5f5   : > { %2838 = vtanh.f32 %v1241_v4 }
 0x5fb   : > { %v2839_v5 = vpop.eup %2838 }
 0x5fc   : > { %v1243_v7 = vadd.f32 1.0, %v2839_v5 }
 0x5fe   : > { %v1244_v9 = vmul.f32 %v1243_v7, %v1236_v6 }
 0x600   : > { %v1245_v10 = vpack.c.bf16 %v1244_v9, %v1244_v9  ;;  %v2806_v9 = vld [vmem:[%s3447_s5 + $0x12] ss:$0 sm:$0xff] }
 0x602   : > { %2471 = vmatmul.msk.bf16.vlgmr.msra.gmra.mxu1 %vm1279_vm10, %v1245_v10  ;;  %v2807_v10 = vld [vmem:[%s3447_s5 + $0x13] ss:$0 sm:$0xff] }
 0x603   : > { %1618 = vmatpush.bf16.msra.mxu1 %v2760_v35 }
 0x607   : > { %1619 = vmatpush.bf16.msra.mxu1 %v2759_v40 }
 0x67f   : > { %v1292_v12 = vpop.f32.mrf.mxu1 }
 0x680   : > { %v1293_v13 = vadd.f32 %v1292_v12, %v1254_v11 }
 0x682   : > { %v1296_v14 = vadd.f32 %v1293_v13, %v1198_v53 }
 0x684   : > { %v1297_v15 = vsel %vm427_vm0, %v1296_v14, 0.0 }
 0x685   : > { %1298 = vadd.xlane.f32.xlu0 %v1297_v15  ;;  %v2808_v15 = vld [vmem:[%s3447_s5 + $0x10] ss:$0 sm:$0xff] }
 0x687   : > { %v1294_v16 = vpop.f32.mrf.mxu1 }
 0x688   : > { %v2809_v16 = vld [vmem:[%s3447_s5 + $0x11] ss:$0 sm:$0xff] }
 0x6f8   : > { %v1299_v17 = vpop.xlane.xlu0 %1298 }
 0x6f9   : > { %v1300_v18 = vmul.f32 %v1299_v17, %v2962_v8  ;;  %v2802_v17 = vld [vmem:[%s3447_s5 + $0xe] ss:$0 sm:$0xff] }
 0x6fb   : > { %v1301_v19 = vsub.f32 %v1296_v14, %v1300_v18  ;;  %v2803_v18 = vld [vmem:[%s3447_s5 + $0xf] ss:$0 sm:$0xff] }
 0x6fd   : > { %v1302_v20 = vmul.f32 %v1301_v19, %v1301_v19 }
 0x6ff   : > { %v1303_v21 = vsel %vm427_vm0, %v1302_v20, 0.0 }
 0x700   : > { %1304 = vadd.xlane.f32.xlu1 %v1303_v21 }
 0x773   : > { %v1305_v30 = vpop.xlane.xlu1 %1304 }
 0x774   : > { %v1306_v34 = vmul.f32 %v1305_v30, %v2962_v8  ;;  %v2805_v30 = vld [vmem:[%s3447_s5 + $0xd] ss:$0 sm:$0xff] }
 0x776   : > { %v1307_v38 = vadd.f32 1e-12, %v1306_v34 }
 0x778   : > { %2840 = vrsqrt.f32 %v1307_v38  ;;  %vm1314_vm12 = vweird.f32 %v1307_v38 }
 0x77e   : > { %v2841_v41 = vpop.eup %2840 }
 0x77f   : > { %v1309_v42 = vmul.f32 %v2841_v41, %v1307_v38  ;;  %vm1315_vm11 = vweird.f32 %v2841_v41 }
 0x780   : > { %vm1316_vm13 = vmor %vm1314_vm12, %vm1315_vm11 }
 0x781   : > { %v1310_v43 = vmul.f32 %v2841_v41, %v1309_v42 }
 0x783   : > { %v1311_v44 = vmul.f32 0.5, %v1310_v43  ;;  %v2810_v43 = vld [vmem:[%s3447_s5 + $0x16] ss:$0 sm:$0xff] }
 0x785   : > { %v1312_v46 = vsub.f32 1.5, %v1311_v44  ;;  %v2811_v44 = vld [vmem:[%s3447_s5 + $0x17] ss:$0 sm:$0xff] }
 0x787   : > { %v1313_v48 = vmul.f32 %v2841_v41, %v1312_v46 }
 0x789   : > { %v1317_v50 = vsel %vm1316_vm13, %v2841_v41, %v1313_v48 }
 0x78a   : > { %v1318_v52 = vmul.f32 %v1317_v50, %v1301_v19 }
 0x78c   : > { %v1320_v53 = vmul.f32 %v1319_v49, %v1318_v52 }
 0x78e   : > { %v3248_v54 = vadd.f32 %v1321_v51, %v1320_v53  ;;  %v2812_v53 = vld [vmem:[%s3447_s5 + $0x14] ss:$0 sm:$0xff] }
 0x790   : > { %v1323_v55 = vpack.c.bf16 %v3248_v54, %v3248_v54 }
 0x792   : > { %2540 = vmatmul.msk.bf16.vlgmr.msra.gmra.mxu2 %vm427_vm0, %v1323_v55  ;;  %2549 = vmatmul.msk.bf16.vlgmr.msra.gmra.mxu3 %vm427_vm0, %v1323_v55 }
 0x793   : > { %2558 = vmatmul.msk.bf16.vlgmr.msrb.gmra.mxu0 %vm427_vm0, %v1323_v55  ;;  %2567 = vmatmul.msk.bf16.vlgmr.msrb.gmra.mxu1 %vm427_vm0, %v1323_v55 }
 0x794   : > { %1643 = vmatpush.bf16.msra.mxu2 %v2762_v56  ;;  %1668 = vmatpush.bf16.msra.mxu3 %v2764_v57 }
 0x795   : > { %1693 = vmatpush.bf16.msrb.mxu0 %v2766_v37  ;;  %1718 = vmatpush.bf16.msrb.mxu1 %v2768_v58 }
 0x798   : > { %1644 = vmatpush.bf16.msra.mxu2 %v2761_v59  ;;  %1669 = vmatpush.bf16.msra.mxu3 %v2763_v60 }
 0x799   : > { %1694 = vmatpush.bf16.msrb.mxu0 %v2765_v61  ;;  %1719 = vmatpush.bf16.msrb.mxu1 %v2767_v63 }
 0x7a2   : > { %2576 = vmatmul.msk.bf16.vlgmr.msrb.gmra.mxu2 %vm427_vm0, %v1323_v55  ;;  %2585 = vmatmul.msk.bf16.vlgmr.msrb.gmra.mxu3 %vm427_vm0, %v1323_v55 }
 0x7a3   : > { %2594 = vmatmul.msk.bf16.vlgmr.msra.gmra.mxu0 %vm427_vm0, %v1323_v55  ;;  %2603 = vmatmul.msk.bf16.vlgmr.msra.gmra.mxu1 %vm427_vm0, %v1323_v55 }
 0x7b2   : > { %2612 = vmatmul.msk.bf16.vlgmr.msra.gmra.mxu2 %vm427_vm0, %v1323_v55  ;;  %2621 = vmatmul.msk.bf16.vlgmr.msra.gmra.mxu3 %vm427_vm0, %v1323_v55 }
 0x7b3   : > { %2630 = vmatmul.msk.bf16.vlgmr.msrb.gmra.mxu0 %vm427_vm0, %v1323_v55  ;;  %2639 = vmatmul.msk.bf16.vlgmr.msrb.gmra.mxu1 %vm427_vm0, %v1323_v55  ;;  %v2813_v55 = vld [vmem:[%s3447_s5 + $0x15] ss:$0 sm:$0xff] }
 0x810   : > { %v1496_v0 = vpop.f32.mrf.mxu0  ;;  %v1521_v1 = vpop.f32.mrf.mxu1 }
 0x811   : > { %v1497_v27 = vadd.f32 %v2802_v17, %v1496_v0  ;;  %v1522_v28 = vadd.f32 %v2803_v18, %v1521_v1 }
 0x813   : > { %v1727_v45 = vpack.c.bf16 %v1497_v27, %v1497_v27  ;;  %v1728_v38 = vpack.c.bf16 %v1522_v28, %v1522_v28 }
 0x815   : > { %v1446_v2 = vpop.f32.mrf.mxu2  ;;  %v1471_v3 = vpop.f32.mrf.mxu3 }
 0x816   : > { %v1447_v39 = vadd.f32 %v2804_v29, %v1446_v2  ;;  %v1472_v40 = vadd.f32 %v2805_v30, %v1471_v3 }
 0x818   : > { %v1498_v4 = vpop.f32.mrf.mxu0  ;;  %v1523_v5 = vpop.f32.mrf.mxu1  ;;  %v1725_v46 = vpack.c.bf16 %v1447_v39, %v1447_v39  ;;  %v1726_v48 = vpack.c.bf16 %v1472_v40, %v1472_v40 }
 0x81d   : > { %v1448_v6 = vpop.f32.mrf.mxu2  ;;  %v1473_v7 = vpop.f32.mrf.mxu3 }
 0x820   : > { %v1596_v11 = vpop.f32.mrf.mxu0  ;;  %v1621_v12 = vpop.f32.mrf.mxu1 }
 0x821   : > { %v1597_v13 = vadd.f32 %v2806_v9, %v1596_v11  ;;  %v1622_v14 = vadd.f32 %v2807_v10, %v1621_v12 }
 0x823   : > { %v1731_v19 = vpack.c.bf16 %v1597_v13, %v1597_v13  ;;  %v1732_v20 = vpack.c.bf16 %v1622_v14, %v1622_v14 }
 0x825   : > { %v1775_v21 = vsel %vm873_vm5, %v1731_v19, 0  ;;  %v1794_v22 = vsel %vm873_vm5, %v1732_v20, 0  ;;  %v1546_v23 = vpop.f32.mrf.mxu2  ;;  %v1571_v24 = vpop.f32.mrf.mxu3 }
 0x826   : > { %v1547_v25 = vadd.f32 %v2808_v15, %v1546_v23  ;;  %v1572_v26 = vadd.f32 %v2809_v16, %v1571_v24  ;;  %1784 = vmatpush.bf16.xpose.msra.mxu0 %v1775_v21  ;;  %1803 = vmatpush.bf16.xpose.msra.mxu1 %v1794_v22 }
 0x828   : > { %v1729_v31 = vpack.c.bf16 %v1547_v25, %v1547_v25  ;;  %v1730_v32 = vpack.c.bf16 %v1572_v26, %v1572_v26  ;;  %v1598_v33 = vpop.f32.mrf.mxu0  ;;  %v1623_v34 = vpop.f32.mrf.mxu1 }
 0x82a   : > { %v1737_v35 = vsel %vm873_vm5, %v1729_v31, 0  ;;  %v1756_v36 = vsel %vm873_vm5, %v1730_v32, 0 }
 0x82b   : > { %1746 = vmatpush.bf16.xpose.msrb.mxu2 %v1737_v35  ;;  %1765 = vmatpush.bf16.xpose.msrb.mxu3 %v1756_v36 }
 0x82d   : > { %2642 = vmatmul.msk.bf16.vlgmr.msra.gmra.mxu0 %vm873_vm5, %v1727_v45  ;;  %2643 = vmatmul.msk.bf16.vlgmr.msra.gmra.mxu1 %vm873_vm5, %v1728_v38  ;;  %v1548_v41 = vpop.f32.mrf.mxu2  ;;  %v1573_v42 = vpop.f32.mrf.mxu3 }
 0x830   : > { %v1696_v49 = vpop.f32.mrf.mxu0  ;;  %v1721_v50 = vpop.f32.mrf.mxu1 }
 0x831   : > { %v1697_v51 = vadd.f32 %v2810_v43, %v1696_v49  ;;  %v1722_v52 = vadd.f32 %v2811_v44, %v1721_v50 }
 0x832   : > { %2640 = vmatmul.msk.bf16.vlgmr.msrb.gmra.mxu2 %vm873_vm5, %v1725_v46  ;;  %2641 = vmatmul.msk.bf16.vlgmr.msrb.gmra.mxu3 %vm873_vm5, %v1726_v48 }
 0x833   : > { %v1859_v56 = vpack.c.bf16 %v1697_v51, %v1697_v51  ;;  %v1860_v57 = vpack.c.bf16 %v1722_v52, %v1722_v52 }
 0x835   : > { %v1903_v37 = vsel %vm1005_vm6, %v1859_v56, 0  ;;  %v1922_v58 = vsel %vm1005_vm6, %v1860_v57, 0  ;;  %v1646_v59 = vpop.f32.mrf.mxu2  ;;  %v1671_v60 = vpop.f32.mrf.mxu3 }
 0x836   : > { %v1647_v61 = vadd.f32 %v2812_v53, %v1646_v59  ;;  %v1672_v63 = vadd.f32 %v2813_v55, %v1671_v60  ;;  %1912 = vmatpush.bf16.msrb.mxu0 %v1903_v37  ;;  %1931 = vmatpush.bf16.msrb.mxu1 %v1922_v58 }
 0x838   : > { %v1857_v0 = vpack.c.bf16 %v1647_v61, %v1647_v61  ;;  %v1858_v1 = vpack.c.bf16 %v1672_v63, %v1672_v63  ;;  %v1698_v2 = vpop.f32.mrf.mxu0  ;;  %v1723_v3 = vpop.f32.mrf.mxu1  ;;  %v2650_v63 = vld [vmem:[%s3448_s6 + $0x18] sm:$0xf] }
 0x839   : > { %v2649_v2 = vld [vmem:[%s3448_s6 + $0x14] sm:$0xf] }
 0x83a   : > { %v1865_v4 = vsel %vm1005_vm6, %v1857_v0, 0  ;;  %v1884_v5 = vsel %vm1005_vm6, %v1858_v1, 0  ;;  %v1988_v0 = vsel %vm1005_vm6, %v2650_v63, 0  ;;  %v2648_v1 = vld [vmem:[%s3448_s6 + $0x10] sm:$0xf]  ;;  %v2774_v63 = vld [vmem:[%s3450_s8 + $0x38] sm:$0xff] }
 0x83b   : > { %1874 = vmatpush.bf16.msra.mxu2 %v1865_v4  ;;  %1893 = vmatpush.bf16.msra.mxu3 %v1884_v5  ;;  %v1950_v3 = vsel %vm1005_vm6, %v2648_v1, 0  ;;  %v1969_v4 = vsel %vm1005_vm6, %v2649_v2, 0  ;;  %v2651_v5 = vld [vmem:[%s3448_s6 + $0x1c] sm:$0xf]  ;;  %v2772_v1 = vld [vmem:[%s3450_s8 + $0x28] sm:$0xff]  ;;  %v2771_v2 = vld [vmem:[%s3450_s8 + $0x20] sm:$0xff] }
 0x83c   : > { %1997 = vmatpush.bf16.msra.mxu0 %v1988_v0  ;;  %v2773_v0 = vld [vmem:[%s3450_s8 + $0x30] sm:$0xff] }
 0x83d   : > { %v1648_v6 = vpop.f32.mrf.mxu2  ;;  %v1673_v7 = vpop.f32.mrf.mxu3 }
 0x83e   : > { %v2007_v6 = vsel %vm1005_vm6, %v2651_v5, 0 }
 0x83f   : > { %1959 = vmatpush.bf16.msrb.mxu2 %v1950_v3  ;;  %1978 = vmatpush.bf16.msrb.mxu3 %v1969_v4  ;;  %v2814_v3 = vld [vmem:[%s3445_s3 + $0x1] ss:$0 sm:$0xff] }
 0x840   : > { %2016 = vmatpush.bf16.msra.mxu1 %v2007_v6 }
 0x8aa   : > { %v1786_v9 = vpop.f32.mrf.mxu0  ;;  %v1805_v10 = vpop.f32.mrf.mxu1 }
 0x8ab   : > { %v1787_v11 = vadd.f32 %v3115_v62, %v1786_v9  ;;  %v1806_v21 = vadd.f32 %v3115_v62, %v1805_v10 }
 0x8ad   : > { %v1815_v12 = vsel %vm873_vm5, %v1787_v11, -inf  ;;  %v1818_v24 = vsel %vm873_vm5, %v1806_v21, -inf }
 0x8ae   : > { %1816 = vmax.xlane.f32.xlu1 %v1815_v12 }
 0x8b2   : > { %v1788_v13 = vpop.f32.mrf.mxu0  ;;  %v1807_v14 = vpop.f32.mrf.mxu1 }
 0x8b5   : > { %v1748_v15 = vpop.f32.mrf.mxu2  ;;  %v1767_v16 = vpop.f32.mrf.mxu3 }
 0x8b6   : > { %v1749_v17 = vadd.f32 %v3115_v62, %v1748_v15  ;;  %v1768_v18 = vadd.f32 %v3115_v62, %v1767_v16 }
 0x8b8   : > { %v1812_v19 = vsel %vm873_vm5, %v1768_v18, -inf  ;;  %v1809_v20 = vsel %vm873_vm5, %v1749_v17, -inf }
 0x8b9   : > { %1813 = vmax.xlane.f32.xlu0 %v1812_v19  ;;  %1810 = vmax.xlane.f32.xlu2 %v1809_v20 }
 0x8bd   : > { %v1750_v22 = vpop.f32.mrf.mxu2  ;;  %v1769_v23 = vpop.f32.mrf.mxu3 }
 0x8c1   : > { %1819 = vmax.xlane.f32.xlu2 %v1818_v24 }
 0x921   : > { %v1817_v25 = vpop.xlane.xlu1 %1816 }
 0x922   : > { %v1823_v26 = vsub.f32 %v1787_v11, %v1817_v25 }
 0x924   : > { %v1829_v27 = vmul.f32 1.442695, %v1823_v26 }
 0x926   : > { %2842 = vpow2.f32 %v1829_v27 }
 0x92c   : > { %v2843_v28 = vpop.eup %2842  ;;  %v1814_v29 = vpop.xlane.xlu0 %1813 }
 0x92d   : > { %v1811_v30 = vpop.xlane.xlu2 %1810  ;;  %v1822_v31 = vsub.f32 %v1768_v18, %v1814_v29  ;;  %v1839_v33 = vsel %vm873_vm5, %v2843_v28, 0.0 }
 0x92e   : > { %v1821_v32 = vsub.f32 %v1749_v17, %v1811_v30  ;;  %1840 = vadd.xlane.f32.xlu2 %v1839_v33 }
 0x92f   : > { %v1827_v34 = vmul.f32 1.442695, %v1822_v31  ;;  %v2029_v31 = vperm.slane %v3244_v47, 1 }
 0x930   : > { %v1825_v35 = vmul.f32 1.442695, %v1821_v32 }
 0x931   : > { %2844 = vpow2.f32 %v1827_v34 }
 0x932   : > { %2846 = vpow2.f32 %v1825_v35 }
 0x935   : > { %v1820_v62 = vpop.xlane.xlu2 %1819 }
 0x936   : > { %v1824_v36 = vsub.f32 %v1806_v21, %v1820_v62 }
 0x937   : > { %v2845_v45 = vpop.eup %2844 }
 0x938   : > { %v1831_v38 = vmul.f32 1.442695, %v1824_v36  ;;  %v2847_v39 = vpop.eup %2846  ;;  %v1836_v40 = vsel %vm873_vm5, %v2845_v45, 0.0 }
 0x939   : > { %1837 = vadd.xlane.f32.xlu1 %v1836_v40  ;;  %v1833_v41 = vsel %vm873_vm5, %v2847_v39, 0.0 }
 0x93a   : > { %2848 = vpow2.f32 %v1831_v38  ;;  %1834 = vadd.xlane.f32.xlu0 %v1833_v41 }
 0x940   : > { %v2849_v42 = vpop.eup %2848 }
 0x941   : > { %v1842_v43 = vsel %vm873_vm5, %v2849_v42, 0.0 }
 0x942   : > { %1843 = vadd.xlane.f32.xlu0 %v1842_v43  ;;  %v2770_v43 = vld [vmem:[%s3449_s7 + $0x18] sm:$0xff] }
 0x9a1   : > { %v1841_v44 = vpop.xlane.xlu2 %1840 }
 0x9a2   : > { %2850 = vrcp.f32 %v1841_v44 }
 0x9a8   : > { %v2851_v46 = vpop.eup %2850 }
 0x9a9   : > { %v1851_v48 = vmul.f32 %v2851_v46, %v2843_v28 }
 0x9ab   : > { %v1855_v49 = vpack.c.bf16 %v1851_v48, %v1851_v48 }
 0x9ac   : > { %v1838_v50 = vpop.xlane.xlu1 %1837 }
 0x9ad   : > { %2852 = vrcp.f32 %v1838_v50  ;;  %v1835_v51 = vpop.xlane.xlu0 %1834  ;;  %2646 = vmatmul.msk.bf16.vlgmr.msrb.gmra.mxu0 %vm873_vm5, %v1855_v49 }
 0x9ae   : > { %2854 = vrcp.f32 %v1835_v51 }
 0x9b3   : > { %v2853_v52 = vpop.eup %2852 }
 0x9b4   : > { %v2855_v53 = vpop.eup %2854  ;;  %v1850_v55 = vmul.f32 %v2853_v52, %v2845_v45 }
 0x9b5   : > { %v1849_v56 = vmul.f32 %v2855_v53, %v2847_v39  ;;  %v1844_v57 = vpop.xlane.xlu0 %1843 }
 0x9b6   : > { %v1854_v37 = vpack.c.bf16 %v1850_v55, %v1850_v55  ;;  %2856 = vrcp.f32 %v1844_v57 }
 0x9b7   : > { %v1853_v58 = vpack.c.bf16 %v1849_v56, %v1849_v56  ;;  %v2054_v56 = vperm.slane %v3244_v47, 2 }
 0x9b8   : > { %2645 = vmatmul.msk.bf16.vlgmr.msra.gmra.mxu3 %vm873_vm5, %v1854_v37  ;;  %v2056_v37 = vperm.slane %v3244_v47, 3 }
 0x9b9   : > { %2644 = vmatmul.msk.bf16.vlgmr.msra.gmra.mxu2 %vm873_vm5, %v1853_v58  ;;  %2148 = vmatpush.bf16.msra.mxu3 %v2774_v63 }
 0x9ba   : > { %2090 = vmatpush.bf16.msra.mxu2 %v2770_v43 }
 0x9bc   : > { %v2857_v59 = vpop.eup %2856 }
 0x9bd   : > { %v1852_v60 = vmul.f32 %v2857_v59, %v2849_v42  ;;  %2149 = vmatpush.bf16.msra.mxu3 %v2773_v0 }
 0x9bf   : > { %v1856_v61 = vpack.c.bf16 %v1852_v60, %v1852_v60 }
 0x9c1   : > { %2647 = vmatmul.msk.bf16.vlgmr.msrb.gmra.mxu1 %vm873_vm5, %v1856_v61  ;;  %2150 = vmatpush.bf16.msra.mxu3 %v2772_v1 }
 0x9c5   : > { %2151 = vmatpush.bf16.msra.mxu3 %v2771_v2 }
 0xa2a   : > { %v1914_v7 = vpop.f32.mrf.mxu0 }
 0xa2b   : > { %v1939_v9 = vpack.c.bf16 %v1914_v7, %v1914_v7 }
 0xa2d   : > { %2654 = vmatmul.msk.bf16.vlgmr.msra.gmra.mxu0 %vm873_vm5, %v1939_v9 }
 0xa32   : > { %v1916_v10 = vpop.f32.mrf.mxu0 }
 0xa3b   : > { %v1895_v11 = vpop.f32.mrf.mxu3 }
 0xa3c   : > { %v1876_v12 = vpop.f32.mrf.mxu2  ;;  %v1938_v13 = vpack.c.bf16 %v1895_v11, %v1895_v11 }
 0xa3d   : > { %v1937_v14 = vpack.c.bf16 %v1876_v12, %v1876_v12 }
 0xa3e   : > { %v1933_v15 = vpop.f32.mrf.mxu1  ;;  %2653 = vmatmul.msk.bf16.vlgmr.msrb.gmra.mxu3 %vm873_vm5, %v1938_v13 }
 0xa3f   : > { %v1940_v16 = vpack.c.bf16 %v1933_v15, %v1933_v15  ;;  %2652 = vmatmul.msk.bf16.vlgmr.msrb.gmra.mxu2 %vm873_vm5, %v1937_v14 }
 0xa41   : > { %2655 = vmatmul.msk.bf16.vlgmr.msra.gmra.mxu1 %vm873_vm5, %v1940_v16 }
 0xa43   : > { %v1897_v17 = vpop.f32.mrf.mxu3 }
 0xa44   : > { %v1878_v18 = vpop.f32.mrf.mxu2 }
 0xa45   : > { %v2116_v18 = vperm.slane %v3244_v47, 4 }
 0xa46   : > { %v1935_v19 = vpop.f32.mrf.mxu1 }
 0xaaa   : > { %v1999_v20 = vpop.f32.mrf.mxu0 }
 0xaab   : > { %v2025_v28 = vsel %vm427_vm0, %v1999_v20, 0.0 }
 0xab2   : > { %v2001_v21 = vpop.f32.mrf.mxu0 }
 0xabe   : > { %v2018_v22 = vpop.f32.mrf.mxu1 }
 0xabf   : > { %v2027_v32 = vsel %vm427_vm0, %v2018_v22, 0.0 }
 0xac1   : > { %v1980_v23 = vpop.f32.mrf.mxu3 }
 0xac2   : > { %v1961_v24 = vpop.f32.mrf.mxu2  ;;  %v2023_v25 = vsel %vm427_vm0, %v1980_v23, 0.0 }
 0xac3   : > { %v2022_v26 = vsel %vm427_vm0, %v1961_v24, 0.0 }
 0xac4   : > { %v2024_v27 = vadd.f32 %v2023_v25, %v2022_v26 }
 0xac6   : > { %v2026_v29 = vadd.f32 %v2025_v28, %v2024_v27  ;;  %v2020_v30 = vpop.f32.mrf.mxu1 }
 0xac7   : > { %v2775_v30 = vld [vmem:[%s3451_s9] sm:$0xff] }
 0xac8   : > { %v2028_v33 = vadd.f32 %v2027_v32, %v2026_v29  ;;  %v2776_v29 = vld [vmem:[%s3451_s9 + $0x8] sm:$0xff] }
 0xac9   : > { %v1982_v34 = vpop.f32.mrf.mxu3  ;;  %2211 = vmatpush.bf16.msrb.mxu0 %v2776_v29 }
 0xaca   : > { %v1963_v35 = vpop.f32.mrf.mxu2  ;;  %v2030_v62 = vadd.f32 %v2029_v31, %v2028_v33 }
 0xacc   : > { %v2031_v36 = vadd.f32 %v2030_v62, %v3248_v54  ;;  %v2769_v54 = vld [vmem:[%s3449_s7 + $0x10] sm:$0xff] }
 0xacd   : > { %2091 = vmatpush.bf16.msra.mxu2 %v2769_v54  ;;  %2212 = vmatpush.bf16.msrb.mxu0 %v2775_v30 }
 0xace   : > { %v2032_v45 = vsel %vm427_vm0, %v2031_v36, 0.0 }
 0xacf   : > { %2033 = vadd.xlane.f32.xlu1 %v2032_v45 }
 0xb42   : > { %v2034_v38 = vpop.xlane.xlu1 %2033 }
 0xb43   : > { %v2035_v39 = vmul.f32 %v2034_v38, %v2962_v8 }
 0xb45   : > { %v2036_v40 = vsub.f32 %v2031_v36, %v2035_v39  ;;  %v2180_v39 = vperm.slane %v3244_v47, 5 }
 0xb47   : > { %v2037_v41 = vmul.f32 %v2036_v40, %v2036_v40 }
 0xb49   : > { %v2038_v42 = vsel %vm427_vm0, %v2037_v41, 0.0  ;;  %v2182_v41 = vperm.slane %v3244_v47, 6  ;;  %v2866_v47 = vld [vmem:[%s3444_s2] sm:$0xff] }
 0xb4a   : > { %2039 = vadd.xlane.f32.xlu2 %v2038_v42 }
 0xbbd   : > { %v2040_v44 = vpop.xlane.xlu2 %2039 }
 0xbbe   : > { %v2041_v46 = vmul.f32 %v2040_v44, %v2962_v8  ;;  %v2778_v44 = vld [vmem:[%s3452_s10 + $0x8] sm:$0xff] }
 0xbbf   : > { %2249 = vmatpush.bf16.msrb.mxu1 %v2778_v44 }
 0xbc0   : > { %v2042_v48 = vadd.f32 1e-12, %v2041_v46  ;;  %v2777_v46 = vld [vmem:[%s3452_s10] sm:$0xff] }
 0xbc2   : > { %2858 = vrsqrt.f32 %v2042_v48  ;;  %vm2049_vm15 = vweird.f32 %v2042_v48 }
 0xbc3   : > { %2250 = vmatpush.bf16.msrb.mxu1 %v2777_v46 }
 0xbc8   : > { %v2859_v49 = vpop.eup %2858 }
 0xbc9   : > { %v2044_v50 = vmul.f32 %v2859_v49, %v2042_v48  ;;  %vm2050_vm14 = vweird.f32 %v2859_v49  ;;  %v2189_v48 = vperm.slane %v2866_v47, 2 }
 0xbca   : > { %vm2051_vm1 = vmor %vm2049_vm15, %vm2050_vm14 }
 0xbcb   : > { %v2045_v51 = vmul.f32 %v2859_v49, %v2044_v50 }
 0xbcd   : > { %v2046_v52 = vmul.f32 0.5, %v2045_v51 }
 0xbcf   : > { %v2047_v53 = vsub.f32 1.5, %v2046_v52 }
 0xbd1   : > { %v2048_v55 = vmul.f32 %v2859_v49, %v2047_v53 }
 0xbd3   : > { %v2052_v57 = vsel %vm2051_vm1, %v2859_v49, %v2048_v55  ;;  %v2815_v55 = vld [vmem:[%s3453_s11] ss:$0 sm:$0xff] }
 0xbd4   : > { %v2053_v58 = vmul.f32 %v2052_v57, %v2036_v40 }
 0xbd6   : > { %v2055_v59 = vmul.f32 %v2054_v56, %v2053_v58 }
 0xbd8   : > { %v2057_v60 = vadd.f32 %v2056_v37, %v2055_v59 }
 0xbda   : > { %v2058_v61 = vpack.c.bf16 %v2057_v60, %v2057_v60 }
 0xbdc   : > { %2669 = vmatmul.msk.bf16.vlgmr.msra.gmra.mxu2 %vm427_vm0, %v2058_v61 }
 0xc5f   : > { %v2093_v4 = vpop.f32.mrf.mxu2 }
 0xc60   : > { %v2094_v5 = vadd.f32 %v2814_v3, %v2093_v4 }
 0xc62   : > { %v2098_v6 = vmul.f32 0.044715, %v2094_v5  ;;  %v2097_v14 = vmul.f32 0.5, %v2094_v5 }
 0xc64   : > { %v2099_v7 = vmul.f32 %v2098_v6, %v2094_v5 }
 0xc66   : > { %v2100_v9 = vmul.f32 %v2099_v7, %v2094_v5 }
 0xc67   : > { %v2095_v10 = vpop.f32.mrf.mxu2 }
 0xc68   : > { %v2101_v11 = vadd.f32 %v2100_v9, %v2094_v5 }
 0xc6a   : > { %v2102_v12 = vmul.f32 0.7978846, %v2101_v11 }
 0xc6c   : > { %2860 = vtanh.f32 %v2102_v12 }
 0xc72   : > { %v2861_v13 = vpop.eup %2860 }
 0xc73   : > { %v2104_v15 = vadd.f32 1.0, %v2861_v13 }
 0xc75   : > { %v2105_v16 = vmul.f32 %v2104_v15, %v2097_v14 }
 0xc77   : > { %v2106_v17 = vpack.c.bf16 %v2105_v16, %v2105_v16 }
 0xc79   : > { %2694 = vmatmul.msk.bf16.vlgmr.msra.gmra.mxu3 %vm1279_vm10, %v2106_v17 }
 0xcfc   : > { %v2153_v19 = vpop.f32.mrf.mxu3 }
 0xcfd   : > { %v2154_v20 = vadd.f32 %v2153_v19, %v2116_v18 }
 0xcff   : > { %v2157_v21 = vadd.f32 %v2154_v20, %v2057_v60 }
 0xd01   : > { %v2158_v22 = vsel %vm427_vm0, %v2157_v21, 0.0 }
 0xd02   : > { %2159 = vadd.xlane.f32.xlu0 %v2158_v22 }
 0xd04   : > { %v2155_v23 = vpop.f32.mrf.mxu3 }
 0xd75   : > { %v2160_v24 = vpop.xlane.xlu0 %2159 }
 0xd76   : > { %v2161_v25 = vmul.f32 %v2160_v24, %v2962_v8 }
 0xd78   : > { %v2162_v26 = vsub.f32 %v2157_v21, %v2161_v25 }
 0xd7a   : > { %v2163_v27 = vmul.f32 %v2162_v26, %v2162_v26 }
 0xd7c   : > { %v2164_v28 = vsel %vm427_vm0, %v2163_v27, 0.0 }
 0xd7d   : > { %2165 = vadd.xlane.f32.xlu1 %v2164_v28 }
 0xdf0   : > { %v2166_v31 = vpop.xlane.xlu1 %2165 }
 0xdf1   : > { %v2167_v32 = vmul.f32 %v2166_v31, %v2962_v8 }
 0xdf3   : > { %v2168_v33 = vadd.f32 1e-12, %v2167_v32 }
 0xdf5   : > { %2862 = vrsqrt.f32 %v2168_v33  ;;  %vm2175_vm3 = vweird.f32 %v2168_v33 }
 0xdfb   : > { %v2863_v34 = vpop.eup %2862 }
 0xdfc   : > { %v2170_v35 = vmul.f32 %v2863_v34, %v2168_v33  ;;  %vm2176_vm2 = vweird.f32 %v2863_v34 }
 0xdfd   : > { %vm2177_vm4 = vmor %vm2175_vm3, %vm2176_vm2 }
 0xdfe   : > { %v2171_v62 = vmul.f32 %v2863_v34, %v2170_v35 }
 0xe00   : > { %v2172_v36 = vmul.f32 0.5, %v2171_v62 }
 0xe02   : > { %v2173_v45 = vsub.f32 1.5, %v2172_v36 }
 0xe04   : > { %v2174_v38 = vmul.f32 %v2863_v34, %v2173_v45 }
 0xe06   : > { %v2178_v40 = vsel %vm2177_vm4, %v2863_v34, %v2174_v38 }
 0xe07   : > { %v2179_v42 = vmul.f32 %v2178_v40, %v2162_v26 }
 0xe09   : > { %v2181_v43 = vmul.f32 %v2180_v39, %v2179_v42 }
 0xe0b   : > { %v2183_v54 = vadd.f32 %v2182_v41, %v2181_v43 }
 0xe0d   : > { %v2184_v8 = vpack.c.bf16 %v2183_v54, %v2183_v54 }
 0xe0f   : > { %2703 = vmatmul.msk.bf16.vlgmr.msrb.gmra.mxu0 %vm427_vm0, %v2184_v8 }
 0xe8c   : > { %v2214_v49 = vpop.f32.mrf.mxu0 }
 0xe8d   : > { %v2215_v50 = vadd.f32 %v2214_v49, %v2189_v48 }
 0xe8f   : > { %2864 = vtanh.f32 %v2215_v50 }
 0xe94   : > { %v2216_v51 = vpop.f32.mrf.mxu0 }
 0xe95   : > { %v2865_v52 = vpop.eup %2864 }
 0xe96   : > { %v2219_v53 = vpack.c.bf16 %v2865_v52, %v2865_v52 }
 0xe98   : > { %2712 = vmatmul.msk.bf16.vlgmr.msrb.gmra.mxu1 %vm427_vm0, %v2219_v53 }
 0xf15   : > { %v2252_v56 = vpop.f32.mrf.mxu1 }
 0xf16   : > { %v2253_v57 = vadd.f32 %v2815_v55, %v2252_v56 }
 0xf18   : > { %2256 = vst [vmem:[%s422_s15] sm:$0xff] %v2253_v57 }
 0xf1d   : > { %v2254_v37 = vpop.f32.mrf.mxu1 }
 0xf1e PF: > { %s22_s21 = sadd.s32 1, %s2873_s21  }
 0xf1f   : > { %p19_p4 = scmp.ge.s32.totalorder %s22_s21, 4  }
 0xf21   :  { %21 = sbr.rel (!%p19_p4) target bundleno = 1 (0x1), region = 107 }

</bundles_post_ra>
